<compile_context>
chip_gen: v5e
topology: v5e:2x2
jax: 0.10.0
libtpu: 0.0.40
codegen_flags: <defaults>
</compile_context>

<pallas_src>
import math

import jax
import jax.numpy as jnp
from jax import lax
from jax.experimental import pallas as pl
from jax.experimental.pallas import tpu as pltpu

# ---- synthetic config (CfgMllmEncdec analog) --------------------------------------------
B = 2            # batch (number of chunks)
S = 8            # tokens per chunk (decoder reconstructs S positions)
D = 32           # d_model
DFF = 64         # feed-forward hidden dim
V = 64           # n_vocab
S1 = S + 1       # encoder sequence length: S tokens + 1 learned [EMB] slot
EPS = 1e-5

# ---- packed bias/gain slab lane offsets (f32, shape (1, NBIAS)) --------------------------
OFF_BQKV = 0                      # bq | bk | bv        (3*D)
OFF_BO = OFF_BQKV + 3 * D         # bo                  (D)
OFF_LN1G = OFF_BO + D             # ln1 gamma           (D)
OFF_LN1B = OFF_LN1G + D           # ln1 beta            (D)
OFF_EB1 = OFF_LN1B + D            # encoder ffn b1      (DFF)
OFF_EB2 = OFF_EB1 + DFF           # encoder ffn b2      (D)
OFF_LN2G = OFF_EB2 + D            # ln2 gamma           (D)
OFF_LN2B = OFF_LN2G + D           # ln2 beta            (D)
OFF_EMBTOK = OFF_LN2B + D         # learned [EMB] token (D)
OFF_BEXP = OFF_EMBTOK + D         # decoder expand bias (S*D)
OFF_DB1 = OFF_BEXP + S * D        # decoder ffn b1      (DFF)
OFF_DB2 = OFF_DB1 + DFF           # decoder ffn b2      (D)
OFF_DLNG = OFF_DB2 + D            # decoder ln gamma    (D)
OFF_DLNB = OFF_DLNG + D           # decoder ln beta     (D)
OFF_BVD = OFF_DLNB + D            # vocab decoder bias  (V)
NBIAS = OFF_BVD + V               # = 864

# ---- packed weight slab A (first dim D, bf16, shape (D, WA_N)) ---------------------------
WA_QKV = 0                        # wq | wk | wv        (3*D)
WA_WO = WA_QKV + 3 * D            # attention output    (D)
WA_EW1 = WA_WO + D                # encoder ffn w1      (DFF)
WA_EXP = WA_EW1 + DFF             # decoder expand      (S*D)
WA_DW1 = WA_EXP + S * D           # decoder ffn w1      (DFF)
WA_VD = WA_DW1 + DFF              # vocab decoder       (V)
WA_N = WA_VD + V                  # = 576

# ---- packed weight slab B (first dim DFF, bf16, shape (DFF, 2*D)): enc_w2 | dec_w2 -------


def _layernorm(x, g, b):
    mu = jnp.mean(x, axis=-1, keepdims=True)
    var = jnp.mean((x - mu) ** 2, axis=-1, keepdims=True)
    return (x - mu) * lax.rsqrt(var + EPS) * g + b


# ============================ fused encoder + decoder kernel ==============================
def mllm_fused_kernel(tok_ref, emb_ref, pos_ref, wa_ref, wb_ref, bias_ref, out_ref):
    bf16 = jnp.bfloat16
    scale = 1.0 / math.sqrt(D)

    def bias(off, n):                      # (1, n) f32, static lane slice of the packed slab
        return bias_ref[:, off:off + n]

    # --- run_vocab_encoder: token embedding as one-hot @ table (MXU) + positional enc -----
    ids = tok_ref[...]                                                   # (B*S, 1) int32
    hot = jnp.where(ids == lax.broadcasted_iota(jnp.int32, (B * S, V), 1),
                    1.0, 0.0).astype(bf16)                               # (B*S, V)
    tok_x = jnp.dot(hot, emb_ref[...],                                   # table has sqrt(D) folded in
                    preferred_element_type=jnp.float32) + pos_ref[...]   # (B*S, D) f32

    # append the learned [EMB] slot after each chunk's tokens -> flattened (B*S1, D)
    emb_slot = bias(OFF_EMBTOK, D)                                       # (1, D)
    pieces = []
    for b in range(B):
        pieces.append(tok_x[b * S:(b + 1) * S, :])
        pieces.append(emb_slot)
    x = jnp.concatenate(pieces, axis=0)                                  # (B*S1, D) f32

    # --- encoder layer: fused-QKV single-head self-attention + FFN (post-LN) ---------------
    qkv = jnp.dot(x.astype(bf16), wa_ref[:, WA_QKV:WA_QKV + 3 * D],
                  preferred_element_type=jnp.float32) + bias(OFF_BQKV, 3 * D)   # (B*S1, 3D)
    q = qkv[:, 0:D]
    k = qkv[:, D:2 * D]
    v = qkv[:, 2 * D:3 * D]

    ctx_parts = []
    for b in range(B):                                   # B=2: statically unrolled attention
        lo = b * S1
        qb = q[lo:lo + S1, :].astype(bf16)
        kb = k[lo:lo + S1, :].astype(bf16)
        vb = v[lo:lo + S1, :].astype(bf16)
        s = jnp.einsum("qd,kd->qk", qb, kb,
                       preferred_element_type=jnp.float32) * scale       # (S1, S1) f32
        s = s - jnp.max(s, axis=-1, keepdims=True)
        ex = jnp.exp(s)
        pattn = ex * pl.reciprocal(jnp.sum(ex, axis=-1, keepdims=True), approx=True)
        ctx_parts.append(jnp.dot(pattn.astype(bf16), vb,
                                 preferred_element_type=jnp.float32))    # (S1, D)
    ctx = jnp.concatenate(ctx_parts, axis=0)                             # (B*S1, D) f32

    attn = jnp.dot(ctx.astype(bf16), wa_ref[:, WA_WO:WA_WO + D],
                   preferred_element_type=jnp.float32) + bias(OFF_BO, D)
    h = _layernorm(x + attn, bias(OFF_LN1G, D), bias(OFF_LN1B, D))
    ff = jnp.maximum(
        jnp.dot(h.astype(bf16), wa_ref[:, WA_EW1:WA_EW1 + DFF],
                preferred_element_type=jnp.float32) + bias(OFF_EB1, DFF), 0.0)
    ff = jnp.dot(ff.astype(bf16), wb_ref[:, 0:D],
                 preferred_element_type=jnp.float32) + bias(OFF_EB2, D)
    enc = _layernorm(h + ff, bias(OFF_LN2G, D), bias(OFF_LN2B, D))       # (B*S1, D)

    # --- with_emb_mat = False: keep only the [EMB] slot of every chunk ---------------------
    e_emb = jnp.concatenate(
        [enc[b * S1 + S:b * S1 + S + 1, :] for b in range(B)], axis=0)   # (B, D)

    # --- EmbDecoder: expand D -> S*D in one matmul, then relayout positions to rows --------
    y = jnp.dot(e_emb.astype(bf16), wa_ref[:, WA_EXP:WA_EXP + S * D],
                preferred_element_type=jnp.float32) + bias(OFF_BEXP, S * D)     # (B, S*D)
    y2 = jnp.concatenate(
        [y[b:b + 1, s0 * D:(s0 + 1) * D] for b in range(B) for s0 in range(S)],
        axis=0)                                                          # (B*S, D), b-major

    f = jnp.maximum(
        jnp.dot(y2.astype(bf16), wa_ref[:, WA_DW1:WA_DW1 + DFF],
                preferred_element_type=jnp.float32) + bias(OFF_DB1, DFF), 0.0)
    f = jnp.dot(f.astype(bf16), wb_ref[:, D:2 * D],
                preferred_element_type=jnp.float32) + bias(OFF_DB2, D)
    z = _layernorm(y2 + f, bias(OFF_DLNG, D), bias(OFF_DLNB, D))         # (B*S, D)

    # --- VocabDecoder: logits (B*S, V); reshaped to (B, S, V) by the wrapper ---------------
    out_ref[...] = jnp.dot(z.astype(bf16), wa_ref[:, WA_VD:WA_VD + V],
                           preferred_element_type=jnp.float32) + bias(OFF_BVD, V)


# ================================ pallas_call wrapper =====================================
def mllm_encdec_forward(tokens, kp):
    """forward(inp_chunks) -> logits (B, S, V).  All glue outside the kernel is free reshapes."""
    ids_col = tokens.reshape(B * S, 1).astype(jnp.int32)
    logits_flat = pl.pallas_call(
        mllm_fused_kernel,
        out_shape=jax.ShapeDtypeStruct((B * S, V), jnp.float32),
        cost_estimate=pl.CostEstimate(flops=600_000, transcendentals=300,
                                      bytes_accessed=64 * 1024),
        compiler_params=pltpu.CompilerParams(vmem_limit_bytes=4 * 1024 * 1024),
    )(ids_col, kp["emb_bf"], kp["pos_rep"], kp["wA"], kp["wB"], kp["bias"])
    return logits_flat.reshape(B, S, V)


# ============================== deterministic parameter init =============================
def _sinusoidal_pos(seq, d):
    pos = jnp.arange(seq, dtype=jnp.float32)[:, None]
    i = jnp.arange(d // 2, dtype=jnp.float32)[None, :]
    angle = pos / jnp.power(10000.0, 2.0 * i / d)
    return jnp.concatenate([jnp.sin(angle), jnp.cos(angle)], axis=-1)      # (seq, d)


def _xavier(key, shape, fan_in=None, fan_out=None):
    fi = shape[-2] if fan_in is None else fan_in
    fo = shape[-1] if fan_out is None else fan_out
    limit = math.sqrt(6.0 / (fi + fo))
    return jax.random.uniform(key, shape, jnp.float32, -limit, limit)


def _uni(key, shape):
    # mimics nn.init.uniform_(p, -0.1, 0.1) applied to all 1-D params in MllmEncdec.__init__
    return jax.random.uniform(key, shape, jnp.float32, -0.1, 0.1)


def init_params(key):
    ks = iter(jax.random.split(key, 32))
    p = {}
    p["emb_table"] = _xavier(next(ks), (V, D))
    p["pos_enc"] = _sinusoidal_pos(S, D)
    p["emb_token"] = _uni(next(ks), (D,))
    for nm in ("wq", "wk", "wv", "wo"):
        p[nm] = _xavier(next(ks), (D, D))
    for nm in ("bq", "bk", "bv", "bo"):
        p[nm] = _uni(next(ks), (D,))
    p["ln1_g"] = _uni(next(ks), (D,)); p["ln1_b"] = _uni(next(ks), (D,))
    p["enc_w1"] = _xavier(next(ks), (D, DFF)); p["enc_b1"] = _uni(next(ks), (DFF,))
    p["enc_w2"] = _xavier(next(ks), (DFF, D)); p["enc_b2"] = _uni(next(ks), (D,))
    p["ln2_g"] = _uni(next(ks), (D,)); p["ln2_b"] = _uni(next(ks), (D,))
    p["wexp"] = _xavier(next(ks), (S, D, D), fan_in=D, fan_out=S * D)      # Linear(D, S*D)
    p["bexp"] = _uni(next(ks), (S, D))
    p["dec_w1"] = _xavier(next(ks), (D, DFF)); p["dec_b1"] = _uni(next(ks), (DFF,))
    p["dec_w2"] = _xavier(next(ks), (DFF, D)); p["dec_b2"] = _uni(next(ks), (D,))
    p["dln_g"] = _uni(next(ks), (D,)); p["dln_b"] = _uni(next(ks), (D,))
    p["wvd"] = _xavier(next(ks), (D, V)); p["bvd"] = _uni(next(ks), (V,))
    return p


def prepare_kernel_params(p):
    """Pack kernel-ready operands once, outside jit: bf16 weight slabs + one f32 bias slab."""
    bf16 = jnp.bfloat16
    kp = {}
    # token-embedding table with the sqrt(D) scale folded in; kept resident in VMEM (2 KiB)
    kp["emb_bf"] = (p["emb_table"] * math.sqrt(D)).astype(bf16)            # (V, D)
    kp["pos_rep"] = jnp.tile(p["pos_enc"], (B, 1)).astype(jnp.float32)     # (B*S, D)
    # expand weight (S, Din, Dout) -> (Din, S*Dout) so y = e @ wexp (column block s = pos s)
    wexp_flat = jnp.transpose(p["wexp"], (1, 0, 2)).reshape(D, S * D)
    kp["wA"] = jnp.concatenate(
        [p["wq"], p["wk"], p["wv"], p["wo"], p["enc_w1"],
         wexp_flat, p["dec_w1"], p["wvd"]], axis=1).astype(bf16)           # (D, WA_N)
    kp["wB"] = jnp.concatenate([p["enc_w2"], p["dec_w2"]], axis=1).astype(bf16)  # (DFF, 2D)

    row = lambda a: jnp.asarray(a, jnp.float32).reshape(1, -1)
    kp["bias"] = jnp.concatenate(
        [row(p["bq"]), row(p["bk"]), row(p["bv"]), row(p["bo"]),
         row(p["ln1_g"]), row(p["ln1_b"]), row(p["enc_b1"]), row(p["enc_b2"]),
         row(p["ln2_g"]), row(p["ln2_b"]), row(p["emb_token"]),
         row(p["bexp"]), row(p["dec_b1"]), row(p["dec_b2"]),
         row(p["dln_g"]), row(p["dln_b"]), row(p["bvd"])], axis=1)         # (1, NBIAS) f32
    assert kp["wA"].shape == (D, WA_N)
    assert kp["wB"].shape == (DFF, 2 * D)
    assert kp["bias"].shape == (1, NBIAS)
    return kp


if __name__ == "__main__":
    root = jax.random.PRNGKey(0)
    pkey, tkey = jax.random.split(root)
    params = init_params(pkey)
    kparams = prepare_kernel_params(params)
    inp_chunks = jax.random.randint(tkey, (B, S), 0, V, dtype=jnp.int32)   # token ids

    logits = jax.jit(mllm_encdec_forward)(inp_chunks, kparams)
    jax.block_until_ready(logits)

    assert logits.shape == (B, S, V), logits.shape
    assert logits.dtype == jnp.float32
    assert bool(jnp.all(jnp.isfinite(logits)))
    print("KERNEL_OK")
</pallas_src>

<mosaic_0001>
module attributes {stable_mosaic.version = 11 : i64} {
  func.func @mllm_fused_kernel(%arg0: memref<16x1xi32, #tpu.memory_space<vmem>>, %arg1: memref<64x32xbf16, #tpu.memory_space<vmem>>, %arg2: memref<16x32xf32, #tpu.memory_space<vmem>>, %arg3: memref<32x576xbf16, #tpu.memory_space<vmem>>, %arg4: memref<64x64xbf16, #tpu.memory_space<vmem>>, %arg5: memref<1x864xf32, #tpu.memory_space<vmem>>, %arg6: memref<16x64xf32, #tpu.memory_space<vmem>>) attributes {dimension_semantics = [], scalar_prefetch = 0 : i64, scratch_operands = 0 : i64, tpu.core_type = #tpu.core_type<tc>} {
    %c0 = arith.constant 0 : index
    %c0_0 = arith.constant 0 : index
    %0 = vector.load %arg0[%c0, %c0_0] : memref<16x1xi32, #tpu.memory_space<vmem>>, vector<16x1xi32>
    %1 = tpu.iota {dimensions = array<i32: 1>} : vector<16x64xi32>
    %2 = vector.broadcast %0 : vector<16x1xi32> to vector<16x64xi32>
    %3 = arith.cmpi eq, %2, %1 : vector<16x64xi32>
    %cst = arith.constant 1.000000e+00 : f32
    %cst_1 = arith.constant 0.000000e+00 : f32
    %4 = vector.broadcast %cst : f32 to vector<16x64xf32>
    %5 = vector.broadcast %cst_1 : f32 to vector<16x64xf32>
    %6 = arith.select %3, %4, %5 : vector<16x64xi1>, vector<16x64xf32>
    %7 = arith.truncf %6 : vector<16x64xf32> to vector<16x64xbf16>
    %c0_2 = arith.constant 0 : index
    %c0_3 = arith.constant 0 : index
    %8 = vector.load %arg1[%c0_2, %c0_3] : memref<64x32xbf16, #tpu.memory_space<vmem>>, vector<64x32xbf16>
    %cst_4 = arith.constant dense<0.000000e+00> : vector<16x32xf32>
    %9 = tpu.matmul %7, %8, %cst_4 {dimension_numbers = #tpu.dot_dimension_numbers<[1], [0], [0], [1], [0, 0, 1, 1], [], []>} : vector<16x64xbf16>, vector<64x32xbf16>, vector<16x32xf32> -> vector<16x32xf32>
    %c0_5 = arith.constant 0 : index
    %c0_6 = arith.constant 0 : index
    %10 = vector.load %arg2[%c0_5, %c0_6] : memref<16x32xf32, #tpu.memory_space<vmem>>, vector<16x32xf32>
    %11 = arith.addf %9, %10 : vector<16x32xf32>
    %c0_7 = arith.constant 0 : index
    %c352 = arith.constant 352 : index
    %12 = vector.load %arg5[%c0_7, %c352] : memref<1x864xf32, #tpu.memory_space<vmem>>, vector<1x32xf32>
    %13 = vector.extract_strided_slice %11 {offsets = [0, 0], sizes = [8, 32], strides = [1, 1]} : vector<16x32xf32> to vector<8x32xf32>
    %14 = vector.extract_strided_slice %11 {offsets = [8, 0], sizes = [8, 32], strides = [1, 1]} : vector<16x32xf32> to vector<8x32xf32>
    %15 = tpu.concatenate %13, %12, %14, %12 in 0 : vector<8x32xf32>, vector<1x32xf32>, vector<8x32xf32>, vector<1x32xf32> -> vector<18x32xf32>
    %16 = arith.truncf %15 : vector<18x32xf32> to vector<18x32xbf16>
    %c0_8 = arith.constant 0 : index
    %c0_9 = arith.constant 0 : index
    %17 = vector.load %arg3[%c0_8, %c0_9] : memref<32x576xbf16, #tpu.memory_space<vmem>>, vector<32x96xbf16>
    %cst_10 = arith.constant dense<0.000000e+00> : vector<18x96xf32>
    %18 = tpu.matmul %16, %17, %cst_10 {dimension_numbers = #tpu.dot_dimension_numbers<[1], [0], [0], [1], [0, 0, 1, 1], [], []>} : vector<18x32xbf16>, vector<32x96xbf16>, vector<18x96xf32> -> vector<18x96xf32>
    %c0_11 = arith.constant 0 : index
    %c0_12 = arith.constant 0 : index
    %19 = vector.load %arg5[%c0_11, %c0_12] : memref<1x864xf32, #tpu.memory_space<vmem>>, vector<1x96xf32>
    %20 = vector.broadcast %19 : vector<1x96xf32> to vector<18x96xf32>
    %21 = arith.addf %18, %20 : vector<18x96xf32>
    %22 = vector.extract_strided_slice %21 {offsets = [0, 0], sizes = [18, 32], strides = [1, 1]} : vector<18x96xf32> to vector<18x32xf32>
    %23 = vector.extract_strided_slice %21 {offsets = [0, 32], sizes = [18, 32], strides = [1, 1]} : vector<18x96xf32> to vector<18x32xf32>
    %24 = vector.extract_strided_slice %21 {offsets = [0, 64], sizes = [18, 32], strides = [1, 1]} : vector<18x96xf32> to vector<18x32xf32>
    %25 = vector.extract_strided_slice %22 {offsets = [0, 0], sizes = [9, 32], strides = [1, 1]} : vector<18x32xf32> to vector<9x32xf32>
    %26 = arith.truncf %25 : vector<9x32xf32> to vector<9x32xbf16>
    %27 = vector.extract_strided_slice %23 {offsets = [0, 0], sizes = [9, 32], strides = [1, 1]} : vector<18x32xf32> to vector<9x32xf32>
    %28 = arith.truncf %27 : vector<9x32xf32> to vector<9x32xbf16>
    %29 = vector.extract_strided_slice %24 {offsets = [0, 0], sizes = [9, 32], strides = [1, 1]} : vector<18x32xf32> to vector<9x32xf32>
    %30 = arith.truncf %29 : vector<9x32xf32> to vector<9x32xbf16>
    "tpu.trace_start"() <{level = 10 : i32, message = "qd,kd->qk"}> : () -> ()
    %cst_13 = arith.constant dense<0.000000e+00> : vector<9x9xf32>
    %31 = tpu.matmul %26, %28, %cst_13 {dimension_numbers = #tpu.dot_dimension_numbers<[1], [1], [0], [0], [0, 0, 1, 0], [], []>} : vector<9x32xbf16>, vector<9x32xbf16>, vector<9x9xf32> -> vector<9x9xf32>
    "tpu.trace_stop"() : () -> ()
    %cst_14 = arith.constant 0.176776692 : f32
    %32 = vector.broadcast %cst_14 : f32 to vector<9x9xf32>
    %33 = arith.mulf %31, %32 : vector<9x9xf32>
    %cst_15 = arith.constant dense<0xFF800000> : vector<9xf32>
    %34 = vector.multi_reduction <maximumf>, %33, %cst_15 [1] : vector<9x9xf32> to vector<9xf32>
    %35 = vector.shape_cast %34 : vector<9xf32> to vector<9x1xf32>
    %36 = vector.broadcast %35 : vector<9x1xf32> to vector<9x9xf32>
    %37 = arith.subf %33, %36 : vector<9x9xf32>
    %38 = math.exp %37 : vector<9x9xf32>
    %cst_16 = arith.constant dense<0.000000e+00> : vector<9xf32>
    %39 = vector.multi_reduction <add>, %38, %cst_16 [1] : vector<9x9xf32> to vector<9xf32>
    %40 = vector.shape_cast %39 : vector<9xf32> to vector<9x1xf32>
    %41 = tpu.reciprocal %40 {approx = true} : vector<9x1xf32> -> vector<9x1xf32>
    %42 = vector.broadcast %41 : vector<9x1xf32> to vector<9x9xf32>
    %43 = arith.mulf %38, %42 : vector<9x9xf32>
    %44 = arith.truncf %43 : vector<9x9xf32> to vector<9x9xbf16>
    %cst_17 = arith.constant dense<0.000000e+00> : vector<9x32xf32>
    %45 = tpu.matmul %44, %30, %cst_17 {dimension_numbers = #tpu.dot_dimension_numbers<[1], [0], [0], [1], [0, 0, 1, 1], [], []>} : vector<9x9xbf16>, vector<9x32xbf16>, vector<9x32xf32> -> vector<9x32xf32>
    %46 = vector.extract_strided_slice %22 {offsets = [9, 0], sizes = [9, 32], strides = [1, 1]} : vector<18x32xf32> to vector<9x32xf32>
    %47 = arith.truncf %46 : vector<9x32xf32> to vector<9x32xbf16>
    %48 = vector.extract_strided_slice %23 {offsets = [9, 0], sizes = [9, 32], strides = [1, 1]} : vector<18x32xf32> to vector<9x32xf32>
    %49 = arith.truncf %48 : vector<9x32xf32> to vector<9x32xbf16>
    %50 = vector.extract_strided_slice %24 {offsets = [9, 0], sizes = [9, 32], strides = [1, 1]} : vector<18x32xf32> to vector<9x32xf32>
    %51 = arith.truncf %50 : vector<9x32xf32> to vector<9x32xbf16>
    "tpu.trace_start"() <{level = 10 : i32, message = "qd,kd->qk"}> : () -> ()
    %cst_18 = arith.constant dense<0.000000e+00> : vector<9x9xf32>
    %52 = tpu.matmul %47, %49, %cst_18 {dimension_numbers = #tpu.dot_dimension_numbers<[1], [1], [0], [0], [0, 0, 1, 0], [], []>} : vector<9x32xbf16>, vector<9x32xbf16>, vector<9x9xf32> -> vector<9x9xf32>
    "tpu.trace_stop"() : () -> ()
    %cst_19 = arith.constant 0.176776692 : f32
    %53 = vector.broadcast %cst_19 : f32 to vector<9x9xf32>
    %54 = arith.mulf %52, %53 : vector<9x9xf32>
    %cst_20 = arith.constant dense<0xFF800000> : vector<9xf32>
    %55 = vector.multi_reduction <maximumf>, %54, %cst_20 [1] : vector<9x9xf32> to vector<9xf32>
    %56 = vector.shape_cast %55 : vector<9xf32> to vector<9x1xf32>
    %57 = vector.broadcast %56 : vector<9x1xf32> to vector<9x9xf32>
    %58 = arith.subf %54, %57 : vector<9x9xf32>
    %59 = math.exp %58 : vector<9x9xf32>
    %cst_21 = arith.constant dense<0.000000e+00> : vector<9xf32>
    %60 = vector.multi_reduction <add>, %59, %cst_21 [1] : vector<9x9xf32> to vector<9xf32>
    %61 = vector.shape_cast %60 : vector<9xf32> to vector<9x1xf32>
    %62 = tpu.reciprocal %61 {approx = true} : vector<9x1xf32> -> vector<9x1xf32>
    %63 = vector.broadcast %62 : vector<9x1xf32> to vector<9x9xf32>
    %64 = arith.mulf %59, %63 : vector<9x9xf32>
    %65 = arith.truncf %64 : vector<9x9xf32> to vector<9x9xbf16>
    %cst_22 = arith.constant dense<0.000000e+00> : vector<9x32xf32>
    %66 = tpu.matmul %65, %51, %cst_22 {dimension_numbers = #tpu.dot_dimension_numbers<[1], [0], [0], [1], [0, 0, 1, 1], [], []>} : vector<9x9xbf16>, vector<9x32xbf16>, vector<9x32xf32> -> vector<9x32xf32>
    %67 = tpu.concatenate %45, %66 in 0 : vector<9x32xf32>, vector<9x32xf32> -> vector<18x32xf32>
    %68 = arith.truncf %67 : vector<18x32xf32> to vector<18x32xbf16>
    %c0_23 = arith.constant 0 : index
    %c96 = arith.constant 96 : index
    %69 = vector.load %arg3[%c0_23, %c96] : memref<32x576xbf16, #tpu.memory_space<vmem>>, vector<32x32xbf16>
    %cst_24 = arith.constant dense<0.000000e+00> : vector<18x32xf32>
    %70 = tpu.matmul %68, %69, %cst_24 {dimension_numbers = #tpu.dot_dimension_numbers<[1], [0], [0], [1], [0, 0, 1, 1], [], []>} : vector<18x32xbf16>, vector<32x32xbf16>, vector<18x32xf32> -> vector<18x32xf32>
    %c0_25 = arith.constant 0 : index
    %c96_26 = arith.constant 96 : index
    %71 = vector.load %arg5[%c0_25, %c96_26] : memref<1x864xf32, #tpu.memory_space<vmem>>, vector<1x32xf32>
    %72 = vector.broadcast %71 : vector<1x32xf32> to vector<18x32xf32>
    %73 = arith.addf %70, %72 : vector<18x32xf32>
    %74 = arith.addf %15, %73 : vector<18x32xf32>
    %c0_27 = arith.constant 0 : index
    %c128 = arith.constant 128 : index
    %75 = vector.load %arg5[%c0_27, %c128] : memref<1x864xf32, #tpu.memory_space<vmem>>, vector<1x32xf32>
    %c0_28 = arith.constant 0 : index
    %c160 = arith.constant 160 : index
    %76 = vector.load %arg5[%c0_28, %c160] : memref<1x864xf32, #tpu.memory_space<vmem>>, vector<1x32xf32>
    %cst_29 = arith.constant dense<0.000000e+00> : vector<18xf32>
    %77 = vector.multi_reduction <add>, %74, %cst_29 [1] : vector<18x32xf32> to vector<18xf32>
    %78 = vector.shape_cast %77 : vector<18xf32> to vector<18x1xf32>
    %cst_30 = arith.constant 3.200000e+01 : f32
    %79 = vector.broadcast %cst_30 : f32 to vector<18x1xf32>
    %80 = arith.divf %78, %79 : vector<18x1xf32>
    %81 = vector.broadcast %80 : vector<18x1xf32> to vector<18x32xf32>
    %82 = arith.subf %74, %81 : vector<18x32xf32>
    %83 = arith.mulf %82, %82 : vector<18x32xf32>
    %cst_31 = arith.constant dense<0.000000e+00> : vector<18xf32>
    %84 = vector.multi_reduction <add>, %83, %cst_31 [1] : vector<18x32xf32> to vector<18xf32>
    %85 = vector.shape_cast %84 : vector<18xf32> to vector<18x1xf32>
    %cst_32 = arith.constant 3.200000e+01 : f32
    %86 = vector.broadcast %cst_32 : f32 to vector<18x1xf32>
    %87 = arith.divf %85, %86 : vector<18x1xf32>
    %88 = vector.broadcast %80 : vector<18x1xf32> to vector<18x32xf32>
    %89 = arith.subf %74, %88 : vector<18x32xf32>
    %cst_33 = arith.constant 9.99999974E-6 : f32
    %90 = vector.broadcast %cst_33 : f32 to vector<18x1xf32>
    %91 = arith.addf %87, %90 : vector<18x1xf32>
    %92 = math.rsqrt %91 : vector<18x1xf32>
    %93 = vector.broadcast %92 : vector<18x1xf32> to vector<18x32xf32>
    %94 = arith.mulf %89, %93 : vector<18x32xf32>
    %95 = vector.broadcast %75 : vector<1x32xf32> to vector<18x32xf32>
    %96 = arith.mulf %94, %95 : vector<18x32xf32>
    %97 = vector.broadcast %76 : vector<1x32xf32> to vector<18x32xf32>
    %98 = arith.addf %96, %97 : vector<18x32xf32>
    %99 = arith.truncf %98 : vector<18x32xf32> to vector<18x32xbf16>
    %c0_34 = arith.constant 0 : index
    %c128_35 = arith.constant 128 : index
    %100 = vector.load %arg3[%c0_34, %c128_35] : memref<32x576xbf16, #tpu.memory_space<vmem>>, vector<32x64xbf16>
    %cst_36 = arith.constant dense<0.000000e+00> : vector<18x64xf32>
    %101 = tpu.matmul %99, %100, %cst_36 {dimension_numbers = #tpu.dot_dimension_numbers<[1], [0], [0], [1], [0, 0, 1, 1], [], []>} : vector<18x32xbf16>, vector<32x64xbf16>, vector<18x64xf32> -> vector<18x64xf32>
    %c0_37 = arith.constant 0 : index
    %c192 = arith.constant 192 : index
    %102 = vector.load %arg5[%c0_37, %c192] : memref<1x864xf32, #tpu.memory_space<vmem>>, vector<1x64xf32>
    %103 = vector.broadcast %102 : vector<1x64xf32> to vector<18x64xf32>
    %104 = arith.addf %101, %103 : vector<18x64xf32>
    %cst_38 = arith.constant 0.000000e+00 : f32
    %105 = vector.broadcast %cst_38 : f32 to vector<18x64xf32>
    %106 = arith.maximumf %104, %105 : vector<18x64xf32>
    %107 = arith.truncf %106 : vector<18x64xf32> to vector<18x64xbf16>
    %c0_39 = arith.constant 0 : index
    %c0_40 = arith.constant 0 : index
    %108 = vector.load %arg4[%c0_39, %c0_40] : memref<64x64xbf16, #tpu.memory_space<vmem>>, vector<64x32xbf16>
    %cst_41 = arith.constant dense<0.000000e+00> : vector<18x32xf32>
    %109 = tpu.matmul %107, %108, %cst_41 {dimension_numbers = #tpu.dot_dimension_numbers<[1], [0], [0], [1], [0, 0, 1, 1], [], []>} : vector<18x64xbf16>, vector<64x32xbf16>, vector<18x32xf32> -> vector<18x32xf32>
    %c0_42 = arith.constant 0 : index
    %c256 = arith.constant 256 : index
    %110 = vector.load %arg5[%c0_42, %c256] : memref<1x864xf32, #tpu.memory_space<vmem>>, vector<1x32xf32>
    %111 = vector.broadcast %110 : vector<1x32xf32> to vector<18x32xf32>
    %112 = arith.addf %109, %111 : vector<18x32xf32>
    %113 = arith.addf %98, %112 : vector<18x32xf32>
    %c0_43 = arith.constant 0 : index
    %c288 = arith.constant 288 : index
    %114 = vector.load %arg5[%c0_43, %c288] : memref<1x864xf32, #tpu.memory_space<vmem>>, vector<1x32xf32>
    %c0_44 = arith.constant 0 : index
    %c320 = arith.constant 320 : index
    %115 = vector.load %arg5[%c0_44, %c320] : memref<1x864xf32, #tpu.memory_space<vmem>>, vector<1x32xf32>
    %cst_45 = arith.constant dense<0.000000e+00> : vector<18xf32>
    %116 = vector.multi_reduction <add>, %113, %cst_45 [1] : vector<18x32xf32> to vector<18xf32>
    %117 = vector.shape_cast %116 : vector<18xf32> to vector<18x1xf32>
    %cst_46 = arith.constant 3.200000e+01 : f32
    %118 = vector.broadcast %cst_46 : f32 to vector<18x1xf32>
    %119 = arith.divf %117, %118 : vector<18x1xf32>
    %120 = vector.broadcast %119 : vector<18x1xf32> to vector<18x32xf32>
    %121 = arith.subf %113, %120 : vector<18x32xf32>
    %122 = arith.mulf %121, %121 : vector<18x32xf32>
    %cst_47 = arith.constant dense<0.000000e+00> : vector<18xf32>
    %123 = vector.multi_reduction <add>, %122, %cst_47 [1] : vector<18x32xf32> to vector<18xf32>
    %124 = vector.shape_cast %123 : vector<18xf32> to vector<18x1xf32>
    %cst_48 = arith.constant 3.200000e+01 : f32
    %125 = vector.broadcast %cst_48 : f32 to vector<18x1xf32>
    %126 = arith.divf %124, %125 : vector<18x1xf32>
    %127 = vector.broadcast %119 : vector<18x1xf32> to vector<18x32xf32>
    %128 = arith.subf %113, %127 : vector<18x32xf32>
    %cst_49 = arith.constant 9.99999974E-6 : f32
    %129 = vector.broadcast %cst_49 : f32 to vector<18x1xf32>
    %130 = arith.addf %126, %129 : vector<18x1xf32>
    %131 = math.rsqrt %130 : vector<18x1xf32>
    %132 = vector.broadcast %131 : vector<18x1xf32> to vector<18x32xf32>
    %133 = arith.mulf %128, %132 : vector<18x32xf32>
    %134 = vector.broadcast %114 : vector<1x32xf32> to vector<18x32xf32>
    %135 = arith.mulf %133, %134 : vector<18x32xf32>
    %136 = vector.broadcast %115 : vector<1x32xf32> to vector<18x32xf32>
    %137 = arith.addf %135, %136 : vector<18x32xf32>
    %138 = vector.extract_strided_slice %137 {offsets = [8, 0], sizes = [1, 32], strides = [1, 1]} : vector<18x32xf32> to vector<1x32xf32>
    %139 = vector.extract_strided_slice %137 {offsets = [17, 0], sizes = [1, 32], strides = [1, 1]} : vector<18x32xf32> to vector<1x32xf32>
    %140 = tpu.concatenate %138, %139 in 0 : vector<1x32xf32>, vector<1x32xf32> -> vector<2x32xf32>
    %141 = arith.truncf %140 : vector<2x32xf32> to vector<2x32xbf16>
    %c0_50 = arith.constant 0 : index
    %c192_51 = arith.constant 192 : index
    %142 = vector.load %arg3[%c0_50, %c192_51] : memref<32x576xbf16, #tpu.memory_space<vmem>>, vector<32x256xbf16>
    %cst_52 = arith.constant dense<0.000000e+00> : vector<2x256xf32>
    %143 = tpu.matmul %141, %142, %cst_52 {dimension_numbers = #tpu.dot_dimension_numbers<[1], [0], [0], [1], [0, 0, 1, 1], [], []>} : vector<2x32xbf16>, vector<32x256xbf16>, vector<2x256xf32> -> vector<2x256xf32>
    %c0_53 = arith.constant 0 : index
    %c384 = arith.constant 384 : index
    %144 = vector.load %arg5[%c0_53, %c384] : memref<1x864xf32, #tpu.memory_space<vmem>>, vector<1x256xf32>
    %145 = vector.broadcast %144 : vector<1x256xf32> to vector<2x256xf32>
    %146 = arith.addf %143, %145 : vector<2x256xf32>
    %147 = vector.extract_strided_slice %146 {offsets = [0, 0], sizes = [1, 32], strides = [1, 1]} : vector<2x256xf32> to vector<1x32xf32>
    %148 = vector.extract_strided_slice %146 {offsets = [0, 32], sizes = [1, 32], strides = [1, 1]} : vector<2x256xf32> to vector<1x32xf32>
    %149 = vector.extract_strided_slice %146 {offsets = [0, 64], sizes = [1, 32], strides = [1, 1]} : vector<2x256xf32> to vector<1x32xf32>
    %150 = vector.extract_strided_slice %146 {offsets = [0, 96], sizes = [1, 32], strides = [1, 1]} : vector<2x256xf32> to vector<1x32xf32>
    %151 = vector.extract_strided_slice %146 {offsets = [0, 128], sizes = [1, 32], strides = [1, 1]} : vector<2x256xf32> to vector<1x32xf32>
    %152 = vector.extract_strided_slice %146 {offsets = [0, 160], sizes = [1, 32], strides = [1, 1]} : vector<2x256xf32> to vector<1x32xf32>
    %153 = vector.extract_strided_slice %146 {offsets = [0, 192], sizes = [1, 32], strides = [1, 1]} : vector<2x256xf32> to vector<1x32xf32>
    %154 = vector.extract_strided_slice %146 {offsets = [0, 224], sizes = [1, 32], strides = [1, 1]} : vector<2x256xf32> to vector<1x32xf32>
    %155 = vector.extract_strided_slice %146 {offsets = [1, 0], sizes = [1, 32], strides = [1, 1]} : vector<2x256xf32> to vector<1x32xf32>
    %156 = vector.extract_strided_slice %146 {offsets = [1, 32], sizes = [1, 32], strides = [1, 1]} : vector<2x256xf32> to vector<1x32xf32>
    %157 = vector.extract_strided_slice %146 {offsets = [1, 64], sizes = [1, 32], strides = [1, 1]} : vector<2x256xf32> to vector<1x32xf32>
    %158 = vector.extract_strided_slice %146 {offsets = [1, 96], sizes = [1, 32], strides = [1, 1]} : vector<2x256xf32> to vector<1x32xf32>
    %159 = vector.extract_strided_slice %146 {offsets = [1, 128], sizes = [1, 32], strides = [1, 1]} : vector<2x256xf32> to vector<1x32xf32>
    %160 = vector.extract_strided_slice %146 {offsets = [1, 160], sizes = [1, 32], strides = [1, 1]} : vector<2x256xf32> to vector<1x32xf32>
    %161 = vector.extract_strided_slice %146 {offsets = [1, 192], sizes = [1, 32], strides = [1, 1]} : vector<2x256xf32> to vector<1x32xf32>
    %162 = vector.extract_strided_slice %146 {offsets = [1, 224], sizes = [1, 32], strides = [1, 1]} : vector<2x256xf32> to vector<1x32xf32>
    %163 = tpu.concatenate %147, %148, %149, %150, %151, %152, %153, %154, %155, %156, %157, %158, %159, %160, %161, %162 in 0 : vector<1x32xf32>, vector<1x32xf32>, vector<1x32xf32>, vector<1x32xf32>, vector<1x32xf32>, vector<1x32xf32>, vector<1x32xf32>, vector<1x32xf32>, vector<1x32xf32>, vector<1x32xf32>, vector<1x32xf32>, vector<1x32xf32>, vector<1x32xf32>, vector<1x32xf32>, vector<1x32xf32>, vector<1x32xf32> -> vector<16x32xf32>
    %164 = arith.truncf %163 : vector<16x32xf32> to vector<16x32xbf16>
    %c0_54 = arith.constant 0 : index
    %c448 = arith.constant 448 : index
    %165 = vector.load %arg3[%c0_54, %c448] : memref<32x576xbf16, #tpu.memory_space<vmem>>, vector<32x64xbf16>
    %cst_55 = arith.constant dense<0.000000e+00> : vector<16x64xf32>
    %166 = tpu.matmul %164, %165, %cst_55 {dimension_numbers = #tpu.dot_dimension_numbers<[1], [0], [0], [1], [0, 0, 1, 1], [], []>} : vector<16x32xbf16>, vector<32x64xbf16>, vector<16x64xf32> -> vector<16x64xf32>
    %c0_56 = arith.constant 0 : index
    %c640 = arith.constant 640 : index
    %167 = vector.load %arg5[%c0_56, %c640] : memref<1x864xf32, #tpu.memory_space<vmem>>, vector<1x64xf32>
    %168 = vector.broadcast %167 : vector<1x64xf32> to vector<16x64xf32>
    %169 = arith.addf %166, %168 : vector<16x64xf32>
    %cst_57 = arith.constant 0.000000e+00 : f32
    %170 = vector.broadcast %cst_57 : f32 to vector<16x64xf32>
    %171 = arith.maximumf %169, %170 : vector<16x64xf32>
    %172 = arith.truncf %171 : vector<16x64xf32> to vector<16x64xbf16>
    %c0_58 = arith.constant 0 : index
    %c32 = arith.constant 32 : index
    %173 = vector.load %arg4[%c0_58, %c32] : memref<64x64xbf16, #tpu.memory_space<vmem>>, vector<64x32xbf16>
    %cst_59 = arith.constant dense<0.000000e+00> : vector<16x32xf32>
    %174 = tpu.matmul %172, %173, %cst_59 {dimension_numbers = #tpu.dot_dimension_numbers<[1], [0], [0], [1], [0, 0, 1, 1], [], []>} : vector<16x64xbf16>, vector<64x32xbf16>, vector<16x32xf32> -> vector<16x32xf32>
    %c0_60 = arith.constant 0 : index
    %c704 = arith.constant 704 : index
    %175 = vector.load %arg5[%c0_60, %c704] : memref<1x864xf32, #tpu.memory_space<vmem>>, vector<1x32xf32>
    %176 = vector.broadcast %175 : vector<1x32xf32> to vector<16x32xf32>
    %177 = arith.addf %174, %176 : vector<16x32xf32>
    %178 = arith.addf %163, %177 : vector<16x32xf32>
    %c0_61 = arith.constant 0 : index
    %c736 = arith.constant 736 : index
    %179 = vector.load %arg5[%c0_61, %c736] : memref<1x864xf32, #tpu.memory_space<vmem>>, vector<1x32xf32>
    %c0_62 = arith.constant 0 : index
    %c768 = arith.constant 768 : index
    %180 = vector.load %arg5[%c0_62, %c768] : memref<1x864xf32, #tpu.memory_space<vmem>>, vector<1x32xf32>
    %cst_63 = arith.constant dense<0.000000e+00> : vector<16xf32>
    %181 = vector.multi_reduction <add>, %178, %cst_63 [1] : vector<16x32xf32> to vector<16xf32>
    %182 = vector.shape_cast %181 : vector<16xf32> to vector<16x1xf32>
    %cst_64 = arith.constant 3.200000e+01 : f32
    %183 = vector.broadcast %cst_64 : f32 to vector<16x1xf32>
    %184 = arith.divf %182, %183 : vector<16x1xf32>
    %185 = vector.broadcast %184 : vector<16x1xf32> to vector<16x32xf32>
    %186 = arith.subf %178, %185 : vector<16x32xf32>
    %187 = arith.mulf %186, %186 : vector<16x32xf32>
    %cst_65 = arith.constant dense<0.000000e+00> : vector<16xf32>
    %188 = vector.multi_reduction <add>, %187, %cst_65 [1] : vector<16x32xf32> to vector<16xf32>
    %189 = vector.shape_cast %188 : vector<16xf32> to vector<16x1xf32>
    %cst_66 = arith.constant 3.200000e+01 : f32
    %190 = vector.broadcast %cst_66 : f32 to vector<16x1xf32>
    %191 = arith.divf %189, %190 : vector<16x1xf32>
    %192 = vector.broadcast %184 : vector<16x1xf32> to vector<16x32xf32>
    %193 = arith.subf %178, %192 : vector<16x32xf32>
    %cst_67 = arith.constant 9.99999974E-6 : f32
    %194 = vector.broadcast %cst_67 : f32 to vector<16x1xf32>
    %195 = arith.addf %191, %194 : vector<16x1xf32>
    %196 = math.rsqrt %195 : vector<16x1xf32>
    %197 = vector.broadcast %196 : vector<16x1xf32> to vector<16x32xf32>
    %198 = arith.mulf %193, %197 : vector<16x32xf32>
    %199 = vector.broadcast %179 : vector<1x32xf32> to vector<16x32xf32>
    %200 = arith.mulf %198, %199 : vector<16x32xf32>
    %201 = vector.broadcast %180 : vector<1x32xf32> to vector<16x32xf32>
    %202 = arith.addf %200, %201 : vector<16x32xf32>
    %203 = arith.truncf %202 : vector<16x32xf32> to vector<16x32xbf16>
    %c0_68 = arith.constant 0 : index
    %c512 = arith.constant 512 : index
    %204 = vector.load %arg3[%c0_68, %c512] : memref<32x576xbf16, #tpu.memory_space<vmem>>, vector<32x64xbf16>
    %cst_69 = arith.constant dense<0.000000e+00> : vector<16x64xf32>
    %205 = tpu.matmul %203, %204, %cst_69 {dimension_numbers = #tpu.dot_dimension_numbers<[1], [0], [0], [1], [0, 0, 1, 1], [], []>} : vector<16x32xbf16>, vector<32x64xbf16>, vector<16x64xf32> -> vector<16x64xf32>
    %c0_70 = arith.constant 0 : index
    %c800 = arith.constant 800 : index
    %206 = vector.load %arg5[%c0_70, %c800] : memref<1x864xf32, #tpu.memory_space<vmem>>, vector<1x64xf32>
    %207 = vector.broadcast %206 : vector<1x64xf32> to vector<16x64xf32>
    %208 = arith.addf %205, %207 : vector<16x64xf32>
    %c0_71 = arith.constant 0 : index
    %c0_72 = arith.constant 0 : index
    %209 = vector.load %arg6[%c0_71, %c0_72] : memref<16x64xf32, #tpu.memory_space<vmem>>, vector<16x64xf32>
    tpu.vector_store %arg6[%c0_71, %c0_72], %208 {strides = array<i32>} : memref<16x64xf32, #tpu.memory_space<vmem>>, vector<16x64xf32>,
    return
  }
}

</mosaic_0001>

<bundles_post_ra>
// kernel: mllm_encdec_forward.1
= control target key start
LH: loop header
LB: loop body
LE: loop exit
PB: predicated region body
PF: predicated region fallthrough
CT: control target
= control target key end

     0   :  { %11 = vsyncpa [#allocation3], 0  ;;  %s1514_s0 = inlined_call_operand.vmem [shape: s32[16,1], index: 0, kind: input, shape index: {}]   ;;  %s1515_s1 = inlined_call_operand.vmem [shape: bf16[64,32], index: 1, kind: input, shape index: {}]   ;;  %s1516_s2 = inlined_call_operand.vmem [shape: f32[16,32], index: 2, kind: input, shape index: {}]   ;;  %s1517_s3 = inlined_call_operand.hbm [shape: bf16[32,576], index: 3, kind: input, shape index: {}]   ;;  %s1518_s4 = inlined_call_operand.vmem [shape: bf16[64,64], index: 4, kind: input, shape index: {}]   ;;  %s1519_s5 = inlined_call_operand.hbm [shape: f32[1,864], index: 5, kind: input, shape index: {}]   ;;  %s1520_s6 = inlined_call_operand.hbm [shape: f32[16,64], index: 6, kind: output, shape index: {}]  }
   0x1   :  { %12 = vsyncpa [#allocation6], 0 }
   0x2   :  { %13 = vsyncpa [#allocation4], 0  ;;  %s24_s23 = sshll.u32 %s1517_s3, 4  ;;  %s1245_s24 = smov [#allocation2]   ;;  %s25_s23 = int_to_ptr.hbm [resolvable:$true] %s24_s23 }
   0x3   :  { %s26_s25 = sshll.u32 %s1245_s24, 4  ;;  %s40_s28 = sshll.u32 %s1519_s5, 4  ;;  %s27_s25 = int_to_ptr.vmem [resolvable:$true] %s26_s25  ;;  %s41_s28 = int_to_ptr.hbm [resolvable:$true] %s40_s28 }
   0x4   :  { %s1246_s29 = smov 320   ;;  %s1247_s30 = smov 20  }
   0x5   :  { %32 = dma.hbm_to_vmem [thread:$0]  %s25_s23, 1280, %s27_s25, [#allocation3], %s1246_s29, %s1246_s29, %s1247_s30  }
   0x6   :  { %s1248_s7 = smov [#allocation5]  }
   0x7   :  { %s42_s8 = sshll.u32 %s1248_s7, 4  ;;  %s43_s8 = int_to_ptr.vmem [resolvable:$true] %s42_s8 }
   0x8   :  { %45 = dma.hbm_to_vmem [thread:$0]  %s41_s28, 112, %s43_s8, [#allocation6]  }
   0x9   :  { %1239 = dma.done.wait [#allocation3], 1280  }
   0xa   :  { %1240 = vsyncadd [#allocation3], 4294966016 }
   0xb   :  { %1241 = dma.done.wait [#allocation6], 112  }
   0xc   :  { %1242 = vsyncadd [#allocation6], 4294967184  ;;  %v1249_v0 = vmov 0   ;;  %v55_v1 = vld [vmem:[%s1514_s0] sm:$0xff]  ;;  %v1094_v2 = vld [vmem:[%s1515_s1 + $0x18] sm:$0xff]  ;;  %s1250_s19 = smov 32   ;;  %v57_v8 = vlaneseq }
   0xd   :  { %1127 = vset.pattern.permute.xlu0 %v1249_v0  ;;  %112 = vmatpush.bf16.msra.mxu0 %v1094_v2  ;;  %v56_v3 = vld [vmem:[%s1514_s0 + $0x8] sm:$0xff]  ;;  %v1093_v4 = vld [vmem:[%s1515_s1 + $0x10] sm:$0xff]  ;;  %v1091_v6 = vld [vmem:[%s1515_s1] sm:$0xff]  ;;  %v1251_v12 = vmov 0.0   ;;  %vm104_vm2 = vcmask 523264   ;;  %vm131_vm3 = vcmask 1040384  }
   0xe   :  { %60 = vperm.xlu0 %1127, %v55_v1   ;;  %v1092_v5 = vld [vmem:[%s1515_s1 + $0x8] sm:$0xff]  ;;  %v1128_v7 = vld [vmem:[#allocation5 + $0x2] ss:$0 sm:$0xff]  ;;  %v58_v10 = vand.u32 127, %v57_v8  ;;  %v1096_v17 = vld [vmem:[#allocation2 + $0x38] sm:$0xf0] }
   0xf   :  { %125 = vrot.lane.b32.xlu1 %v1128_v7, %s1250_s19  ;;  %v1008_v16 = vld [vmem:[#allocation2 + $0x28] sm:$0xf]  ;;  %v1004_v19 = vld [vmem:[#allocation2] sm:$0xf]  ;;  %v1095_v20 = vld [vmem:[#allocation2 + $0x10] sm:$0xf0] }
  0x10   :  { %v1009_v18 = vor.u32 %v1096_v17, %v1008_v16  ;;  %v1005_v21 = vor.u32 %v1095_v20, %v1004_v19  ;;  %v79_v23 = vld [vmem:[%s1516_s2 + $0x8] sm:$0xff]  ;;  %v78_v25 = vld [vmem:[%s1516_s2] sm:$0xff]  ;;  %vm156_vm4 = vcmask 261120   ;;  %v1129_v35 = vld [vmem:[#allocation5] ss:$0 sm:$0xff]  ;;  %s1252_s2 = smov 96  }
  0x11   :  { %113 = vmatpush.bf16.msra.mxu0 %v1093_v4  ;;  %vm207_vm5 = vcmask 72704   ;;  %vm211_vm6 = vcmask 65536   ;;  %s1253_s22 = smov 64   ;;  %vm237_vm7 = vcmask 1043456   ;;  %vm238_vm8 = vcmask 1044480   ;;  %s971_s9 = sshll.u32 %s1520_s6, 4  ;;  %s972_s9 = int_to_ptr.hbm [resolvable:$true] %s971_s9 }
  0x12   :  { %169 = vmatpush.bf16.msra.mxu1 %v1009_v18  ;;  %v1254_v63 = vmov 65535   ;;  %vm405_vm9 = vcmask 254976   ;;  %s1257_s10 = smov 128   ;;  %s1258_s5 = smov 8  }
  0x13   :  { %v239_v0 = vsel %vm237_vm7, 4294967295, %v1254_v63 }
  0x14   :  { %v1350_v2 = vsel %vm238_vm8, %v239_v0, 0 }
  0x15   :  { %114 = vmatpush.bf16.msra.mxu0 %v1092_v5 }
  0x16   :  { %63 = vperm.xlu0 %1127, %v56_v3   ;;  %170 = vmatpush.bf16.msra.mxu1 %v1005_v21 }
  0x19   :  { %115 = vmatpush.bf16.msra.mxu0 %v1091_v6 }
  0x80   :  { %v61_v9 = vpop.permute.xlu0 %60 }
  0x81   :  { %vm65_vm0 = vcmp.eq.s32.totalorder %v61_v9, %v58_v10  ;;  %v126_v27 = vpop.permute.xlu1 %125 }
  0x82   :  { %v67_v13 = vsel %vm65_vm0, 1.0, %v1251_v12 }
  0x88   :  { %v64_v11 = vpop.permute.xlu0 %63 }
  0x89   :  { %vm66_vm1 = vcmp.eq.s32.totalorder %v64_v11, %v58_v10 }
  0x8a   :  { %v68_v14 = vsel %vm66_vm1, 1.0, %v1251_v12 }
  0x8b   :  { %v69_v15 = vpack.c.bf16 %v68_v14, %v67_v13 }
  0x8d   :  { %1001 = vmatmul.msk.bf16.vlgmr.msra.gmra.mxu0 %vm104_vm2, %v69_v15 }
 0x10a   :  { %v117_v22 = vpop.f32.mrf.mxu0 }
 0x10b   :  { %v1326_v29 = vadd.f32 %v117_v22, %v78_v25 }
 0x112   :  { %v119_v24 = vpop.f32.mrf.mxu0 }
 0x113   :  { %v120_v26 = vadd.f32 %v119_v24, %v79_v23 }
 0x115   :  { %v129_v28 = vrot.slane %v120_v26, 7 }
 0x117   :  { %v1329_v30 = vsel %vm131_vm3, %v126_v27, %v129_v28  ;;  %v1335_v32 = vsel %vm131_vm3, %v129_v28, %v126_v27 }
 0x118   :  { %v134_v31 = vpack.c.bf16 %v1329_v30, %v1326_v29  ;;  %v135_v33 = vpack.c.bf16 %v1335_v32, %v1335_v32 }
 0x11a   :  { %1010 = vmatmul.msk.bf16.vlgmr.msra.gmra.mxu1 %vm156_vm4, %v134_v31 }
 0x12a   :  { %1011 = vmatmul.msk.bf16.gmra.mxu1 %vm156_vm4, %v135_v33 }
 0x197   :  { %v172_v34 = vpop.f32.mrf.mxu1 }
 0x198   :  { %v173_v37 = vadd.f32 %v1129_v35, %v172_v34 }
 0x19f   :  { %v174_v36 = vpop.f32.mrf.mxu1 }
 0x1a0   :  { %v175_v38 = vadd.f32 %v1129_v35, %v174_v36 }
 0x1a2   :  { %v181_v39 = vpack.c.bf16 %v175_v38, %v173_v37  ;;  %v1022_v37 = vld [vmem:[#allocation2 + $0x28] sm:$0xf] }
 0x1a4   :  { %183 = vrot.lane.b32.xlu1 %v181_v39, %s1252_s2 }
 0x1a7   :  { %v177_v40 = vpop.f32.mrf.mxu1 }
 0x1a8   :  { %v178_v41 = vadd.f32 %v1129_v35, %v177_v40 }
 0x1aa   :  { %v258_v42 = vpack.c.bf16 %v178_v41, %v175_v38  ;;  %v1098_v38 = vld [vmem:[#allocation2 + $0x38] sm:$0xf0]  ;;  %v1097_v41 = vld [vmem:[#allocation2 + $0x10] sm:$0xf0] }
 0x1ab   :  { %v1023_v40 = vor.u32 %v1098_v38, %v1022_v37  ;;  %v1100_v37 = vld [vmem:[#allocation2 + $0x3c] sm:$0xf0] }
 0x1ac   :  { %v262_v52 = vshll.u32 %v258_v42, 16  ;;  %v260_v54 = vshrl.u32 %v258_v42, 16 }
 0x1ae   :  { %v264_v53 = vrot.slane %v262_v52, 1 }
 0x1af   :  { %v179_v43 = vpop.f32.mrf.mxu1 }
 0x1b0   :  { %v265_v55 = vor.u32 %v264_v53, %v260_v54  ;;  %v1130_v54 = vld [vmem:[#allocation5] ss:$0 sm:$0xff] }
 0x216   :  { %v184_v44 = vpop.permute.xlu1 %183 }
 0x217   :  { %v189_v45 = vsel %vm156_vm4, %v184_v44, 0 }
 0x218   :  { %198 = vmatpush.bf16.xpose.msra.mxu2 %v189_v45 }
 0x21f   :  { %1012 = vmatmul.msk.bf16.vlgmr.msra.gmra.mxu2 %vm156_vm4, %v181_v39 }
 0x2a2   :  { %v200_v46 = vpop.f32.mrf.mxu2 }
 0x2a3   :  { %v205_v47 = vmul.f32 0.17677669, %v200_v46 }
 0x2a5   :  { %v208_v48 = vsel %vm207_vm5, %v205_v47, -inf }
 0x2a6   :  { %209 = vmax.xlane.f32.xlu2 %v208_v48 }
 0x2aa   :  { %v202_v49 = vpop.f32.mrf.mxu2 }
 0x2ab   :  { %v206_v50 = vmul.f32 0.17677669, %v202_v49 }
 0x2ad   :  { %v212_v51 = vsel %vm211_vm6, %v206_v50, -inf }
 0x2ae   :  { %213 = vmax.xlane.f32.xlu2 %v212_v51 }
 0x2c6   :  { %232 = vrot.lane.b32.xlu2 %v181_v39, %s1253_s22  ;;  %v1018_v39 = vld [vmem:[#allocation2] sm:$0xf] }
 0x2c7   :  { %v1019_v42 = vor.u32 %v1097_v41, %v1018_v39  ;;  %v1028_v41 = vld [vmem:[#allocation2 + $0x4] sm:$0xf] }
 0x2ce   :  { %266 = vrot.lane.b32.xlu2 %v265_v55, %s1252_s2 }
 0x319   :  { %v210_v56 = vpop.xlane.xlu2 %209 }
 0x31a   :  { %v215_v57 = vsub.f32 %v205_v47, %v210_v56 }
 0x31c   :  { %v217_v58 = vmul.f32 1.442695, %v215_v57 }
 0x31e   :  { %1135 = vpow2.f32 %v217_v58 }
 0x321   :  { %v214_v59 = vpop.xlane.xlu2 %213 }
 0x322   :  { %v216_v60 = vsub.f32 %v206_v50, %v214_v59 }
 0x324   :  { %v1136_v61 = vpop.eup %1135  ;;  %v219_v62 = vmul.f32 1.442695, %v216_v60 }
 0x325   :  { %v221_v1 = vsel %vm207_vm5, %v1136_v61, 0.0 }
 0x326   :  { %1137 = vpow2.f32 %v219_v62  ;;  %222 = vadd.xlane.f32.xlu0 %v221_v1 }
 0x329   :  { %v233_v3 = vpop.permute.xlu2 %232 }
 0x32a   :  { %v242_v4 = vand.u32 %v1350_v2, %v233_v3 }
 0x32c   :  { %v1138_v5 = vpop.eup %1137  ;;  %251 = vmatpush.bf16.msra.mxu3 %v242_v4 }
 0x32d   :  { %v224_v6 = vsel %vm211_vm6, %v1138_v5, 0.0 }
 0x32e   :  { %225 = vadd.xlane.f32.xlu1 %v224_v6 }
 0x331   :  { %v267_v7 = vpop.permute.xlu2 %266 }
 0x332   :  { %v272_v8 = vsel %vm156_vm4, %v267_v7, 0 }
 0x333   :  { %281 = vmatpush.bf16.xpose.msrb.mxu3 %v272_v8 }
 0x399   :  { %v223_v9 = vpop.xlane.xlu0 %222 }
 0x39a   :  { %1139 = vrcp.f32 %v223_v9 }
 0x3a0   :  { %v1140_v11 = vpop.eup %1139 }
 0x3a1   :  { %v226_v10 = vpop.xlane.xlu1 %225  ;;  %v229_v13 = vmul.f32 %v1140_v11, %v1136_v61 }
 0x3a2   :  { %1141 = vrcp.f32 %v226_v10 }
 0x3a8   :  { %v1142_v12 = vpop.eup %1141 }
 0x3a9   :  { %v230_v14 = vmul.f32 %v1142_v12, %v1138_v5 }
 0x3ab   :  { %v231_v15 = vpack.c.bf16 %v230_v14, %v229_v13 }
 0x3ad   :  { %1013 = vmatmul.msk.bf16.vlgmr.msra.gmra.mxu3 %vm207_vm5, %v231_v15 }
 0x3bd   :  { %1014 = vmatmul.msk.bf16.vlgmr.msrb.gmra.mxu3 %vm156_vm4, %v265_v55 }
 0x430   :  { %v253_v16 = vpop.f32.mrf.mxu3 }
 0x438   :  { %v255_v17 = vpop.f32.mrf.mxu3 }
 0x440   :  { %v283_v18 = vpop.f32.mrf.mxu3 }
 0x441   :  { %v288_v19 = vmul.f32 0.17677669, %v283_v18 }
 0x443   :  { %v290_v20 = vsel %vm207_vm5, %v288_v19, -inf }
 0x444   :  { %291 = vmax.xlane.f32.xlu2 %v290_v20 }
 0x448   :  { %v285_v21 = vpop.f32.mrf.mxu3 }
 0x449   :  { %v289_v22 = vmul.f32 0.17677669, %v285_v21 }
 0x44b   :  { %v293_v23 = vsel %vm211_vm6, %v289_v22, -inf }
 0x44c   :  { %294 = vmax.xlane.f32.xlu0 %v293_v23 }
 0x45c   :  { %362 = vrot.lane.b32.xlu2 %v1019_v42, %s1250_s19  ;;  %v1099_v42 = vld [vmem:[#allocation2 + $0x14] sm:$0xf0] }
 0x4b7   :  { %v292_v24 = vpop.xlane.xlu2 %291 }
 0x4b8   :  { %v296_v25 = vsub.f32 %v288_v19, %v292_v24 }
 0x4ba   :  { %v298_v26 = vmul.f32 1.442695, %v296_v25 }
 0x4bc   :  { %1143 = vpow2.f32 %v298_v26 }
 0x4bf   :  { %v295_v27 = vpop.xlane.xlu0 %294  ;;  %v363_v53 = vpop.permute.xlu2 %362 }
 0x4c0   :  { %v297_v28 = vsub.f32 %v289_v22, %v295_v27 }
 0x4c2   :  { %v1144_v31 = vpop.eup %1143  ;;  %v300_v33 = vmul.f32 1.442695, %v297_v28 }
 0x4c3   :  { %v302_v34 = vsel %vm207_vm5, %v1144_v31, 0.0 }
 0x4c4   :  { %1145 = vpow2.f32 %v300_v33  ;;  %303 = vadd.xlane.f32.xlu1 %v302_v34 }
 0x4ca   :  { %v1146_v35 = vpop.eup %1145 }
 0x4cb   :  { %v305_v36 = vsel %vm211_vm6, %v1146_v35, 0.0 }
 0x4cc   :  { %306 = vadd.xlane.f32.xlu0 %v305_v36  ;;  %v1032_v36 = vld [vmem:[#allocation2 + $0x2c] sm:$0xf] }
 0x4cd   :  { %v1033_v38 = vor.u32 %v1100_v37, %v1032_v36 }
 0x4cf   :  { %518 = vmatpush.bf16.msra.mxu3 %v1033_v38 }
 0x4dd   :  { %313 = vrot.lane.b32.xlu1 %v265_v55, %s1253_s22 }
 0x4e0   :  { %364 = vrot.lane.b32.xlu0 %v1023_v40, %s1250_s19 }
 0x4e5   :  { %368 = vrot.lane.b32.xlu1 %v1130_v54, %s1250_s19 }
 0x537   :  { %v304_v44 = vpop.xlane.xlu1 %303 }
 0x53f   :  { %v307_v43 = vpop.xlane.xlu0 %306 }
 0x540   :  { %1147 = vrcp.f32 %v307_v43  ;;  %v1029_v43 = vor.u32 %v1099_v42, %v1028_v41 }
 0x541   :  { %1149 = vrcp.f32 %v304_v44 }
 0x542   :  { %519 = vmatpush.bf16.msra.mxu3 %v1029_v43 }
 0x546   :  { %v1148_v45 = vpop.eup %1147 }
 0x547   :  { %v1150_v46 = vpop.eup %1149  ;;  %v311_v47 = vmul.f32 %v1148_v45, %v1146_v35  ;;  %v1389_v35 = vld [vmem:[#allocation5 + $0x1] ss:$0 sm:$0xff] }
 0x548   :  { %v310_v50 = vmul.f32 %v1150_v46, %v1144_v31 }
 0x54a   :  { %v312_v51 = vpack.c.bf16 %v311_v47, %v310_v50 }
 0x54f   :  { %v314_v48 = vpop.permute.xlu1 %313 }
 0x550   :  { %v319_v49 = vand.u32 %v314_v48, %v1350_v2 }
 0x552   :  { %328 = vmatpush.bf16.msrb.mxu2 %v319_v49  ;;  %v365_v52 = vpop.permute.xlu0 %364 }
 0x553   :  { %383 = vmatpush.bf16.msrb.mxu0 %v365_v52 }
 0x555   :  { %1015 = vmatmul.msk.bf16.vlgmr.msrb.gmra.mxu2 %vm207_vm5, %v312_v51 }
 0x557   :  { %384 = vmatpush.bf16.msrb.mxu0 %v363_v53  ;;  %v369_v63 = vpop.permute.xlu1 %368 }
 0x5d8   :  { %v330_v55 = vpop.f32.mrf.mxu2 }
 0x5d9   :  { %v337_v56 = vrot.slane %v330_v55, 7 }
 0x5db   :  { %v342_v57 = vsel %vm131_vm3, %v255_v17, %v337_v56 }
 0x5dc   :  { %v343_v58 = vpack.c.bf16 %v342_v57, %v253_v16 }
 0x5de   :  { %1024 = vmatmul.msk.bf16.vlgmr.msrb.gmra.mxu0 %vm156_vm4, %v343_v58 }
 0x5e0   :  { %v332_v59 = vpop.f32.mrf.mxu2 }
 0x5e1   :  { %v338_v60 = vrot.slane %v332_v59, 7 }
 0x5e3   :  { %v339_v61 = vsel %vm131_vm3, %v337_v56, %v338_v60  ;;  %v1401_v60 = vld [vmem:[%s1518_s4 + $0x18] sm:$0xff] }
 0x5e4   :  { %v344_v62 = vpack.c.bf16 %v339_v61, %v339_v61  ;;  %581 = vmatpush.bf16.msrb.mxu1 %v1401_v60 }
 0x5ee   :  { %1025 = vmatmul.msk.bf16.gmra.mxu0 %vm156_vm4, %v344_v62 }
 0x65b   :  { %v386_v0 = vpop.f32.mrf.mxu0 }
 0x65c   :  { %v387_v1 = vadd.f32 %v386_v0, %v369_v63 }
 0x65e   :  { %v395_v2 = vadd.f32 %v387_v1, %v1326_v29  ;;  %v1255_v29 = vmov 32.0  }
 0x65f   :  { %1151 = vrcp.f32 %v1255_v29 }
 0x660   :  { %v399_v3 = vsel %vm156_vm4, %v395_v2, 0.0 }
 0x661   :  { %400 = vadd.xlane.f32.xlu0 %v399_v3 }
 0x663   :  { %v388_v4 = vpop.f32.mrf.mxu0 }
 0x664   :  { %v389_v5 = vadd.f32 %v388_v4, %v369_v63 }
 0x665   :  { %v1152_v13 = vpop.eup %1151 }
 0x666   :  { %v396_v6 = vadd.f32 %v389_v5, %v1329_v30  ;;  %v410_v14 = vmul.f32 32.0, %v1152_v13  ;;  %vm414_vm10 = vweird.f32 %v1152_v13 }
 0x668   :  { %v402_v7 = vsel %vm156_vm4, %v396_v6, 0.0  ;;  %v411_v15 = vsub.f32 1.0, %v410_v14 }
 0x669   :  { %403 = vadd.xlane.f32.xlu1 %v402_v7 }
 0x66a   :  { %v412_v16 = vmul.f32 %v1152_v13, %v411_v15 }
 0x66b   :  { %v391_v8 = vpop.f32.mrf.mxu0 }
 0x66c   :  { %v392_v9 = vadd.f32 %v391_v8, %v369_v63  ;;  %v413_v17 = vadd.f32 %v1152_v13, %v412_v16 }
 0x66e   :  { %v397_v10 = vadd.f32 %v392_v9, %v1335_v32  ;;  %v1377_v30 = vsel %vm414_vm10, %v1152_v13, %v413_v17 }
 0x670   :  { %v406_v11 = vsel %vm405_vm9, %v397_v10, 0.0 }
 0x671   :  { %407 = vadd.xlane.f32.xlu2 %v406_v11 }
 0x673   :  { %v393_v12 = vpop.f32.mrf.mxu0 }
 0x6d4   :  { %v401_v18 = vpop.xlane.xlu0 %400 }
 0x6d5   :  { %v416_v19 = vmul.f32 %v1377_v30, %v401_v18 }
 0x6d7   :  { %v419_v20 = vsub.f32 %v395_v2, %v416_v19 }
 0x6d9   :  { %v422_v21 = vmul.f32 %v419_v20, %v419_v20 }
 0x6db   :  { %v425_v32 = vsel %vm156_vm4, %v422_v21, 0.0  ;;  %v1419_v21 = vld [vmem:[%s1518_s4 + $0x8] sm:$0xff] }
 0x6dc   :  { %v404_v22 = vpop.xlane.xlu1 %403  ;;  %426 = vadd.xlane.f32.xlu0 %v425_v32  ;;  %v1425_v32 = vld [vmem:[%s1518_s4] sm:$0xff] }
 0x6dd   :  { %v417_v23 = vmul.f32 %v1377_v30, %v404_v22 }
 0x6df   :  { %v420_v24 = vsub.f32 %v396_v6, %v417_v23 }
 0x6e1   :  { %v423_v25 = vmul.f32 %v420_v24, %v420_v24 }
 0x6e3   :  { %v428_v26 = vsel %vm156_vm4, %v423_v25, 0.0 }
 0x6e4   :  { %v408_v27 = vpop.xlane.xlu2 %407  ;;  %429 = vadd.xlane.f32.xlu1 %v428_v26 }
 0x6e5   :  { %v418_v28 = vmul.f32 %v1377_v30, %v408_v27 }
 0x6e7   :  { %v1384_v31 = vsub.f32 %v397_v10, %v418_v28 }
 0x6e9   :  { %v424_v33 = vmul.f32 %v1384_v31, %v1384_v31 }
 0x6eb   :  { %v431_v34 = vsel %vm405_vm9, %v424_v33, 0.0 }
 0x6ec   :  { %432 = vadd.xlane.f32.xlu0 %v431_v34 }
 0x6fd   :  { %479 = vrot.lane.b32.xlu1 %v1389_v35, %s1252_s2 }
 0x700   :  { %503 = vrot.lane.b32.xlu0 %v1389_v35, %s1253_s22 }
 0x74f   :  { %v427_v39 = vpop.xlane.xlu0 %426 }
 0x750   :  { %v434_v40 = vmul.f32 %v427_v39, %v1377_v30  ;;  %v1132_v39 = vld [vmem:[#allocation5 + $0x2] ss:$0 sm:$0xff] }
 0x752   :  { %v437_v44 = vadd.f32 1e-05, %v434_v40 }
 0x754   :  { %1153 = vrsqrt.f32 %v437_v44  ;;  %vm446_vm12 = vweird.f32 %v437_v44 }
 0x757   :  { %v430_v45 = vpop.xlane.xlu1 %429 }
 0x758   :  { %v435_v46 = vmul.f32 %v430_v45, %v1377_v30 }
 0x75a   :  { %v1154_v47 = vpop.eup %1153  ;;  %v438_v48 = vadd.f32 1e-05, %v435_v46 }
 0x75b   :  { %v441_v49 = vmul.f32 %v1154_v47, %v437_v44  ;;  %vm447_vm11 = vweird.f32 %v1154_v47 }
 0x75c   :  { %1155 = vrsqrt.f32 %v438_v48  ;;  %vm448_vm13 = vmor %vm446_vm12, %vm447_vm11  ;;  %vm456_vm15 = vweird.f32 %v438_v48 }
 0x75d   :  { %v442_v50 = vmul.f32 %v1154_v47, %v441_v49  ;;  %v1068_v49 = vld [vmem:[#allocation2 + $0x2c] sm:$0xf] }
 0x75f   :  { %v443_v51 = vmul.f32 0.5, %v442_v50  ;;  %v433_v52 = vpop.xlane.xlu0 %432  ;;  %v1109_v50 = vld [vmem:[#allocation2 + $0x3c] sm:$0xf0] }
 0x760   :  { %v436_v53 = vmul.f32 %v433_v52, %v1377_v30  ;;  %v1056_v52 = vld [vmem:[#allocation2 + $0x4] sm:$0xf] }
 0x761   :  { %v444_v54 = vsub.f32 1.5, %v443_v51  ;;  %v1069_v51 = vor.u32 %v1109_v50, %v1068_v49 }
 0x762   :  { %v1156_v55 = vpop.eup %1155  ;;  %v439_v56 = vadd.f32 1e-05, %v436_v53  ;;  %v1106_v53 = vld [vmem:[#allocation2 + $0x14] sm:$0xf0] }
 0x763   :  { %v451_v57 = vmul.f32 %v1156_v55, %v438_v48  ;;  %v445_v58 = vmul.f32 %v1154_v47, %v444_v54  ;;  %vm457_vm14 = vweird.f32 %v1156_v55  ;;  %698 = vrot.lane.b32.xlu1 %v1069_v51, %s1253_s22  ;;  %v1057_v54 = vor.u32 %v1106_v53, %v1056_v52 }
 0x764   :  { %1157 = vrsqrt.f32 %v439_v56  ;;  %vm458_vm0 = vmor %vm456_vm15, %vm457_vm14  ;;  %vm466_vm5 = vweird.f32 %v439_v56  ;;  %vm793_vm15 = vcmask 1041408  }
 0x765   :  { %v452_v59 = vmul.f32 %v1156_v55, %v451_v57  ;;  %v449_v63 = vsel %vm448_vm13, %v1154_v47, %v445_v58 }
 0x766   :  { %v470_v3 = vmul.f32 %v449_v63, %v419_v20  ;;  %v1413_v20 = vld [vmem:[%s1518_s4 + $0x10] sm:$0xff]  ;;  %s1256_s4 = smov [#allocation7]  }
 0x767   :  { %v453_v61 = vmul.f32 0.5, %v452_v59  ;;  %582 = vmatpush.bf16.msrb.mxu1 %v1413_v20  ;;  %s969_s7 = sshll.u32 %s1256_s4, 4  ;;  %s970_s7 = int_to_ptr.vmem [resolvable:$true] %s969_s7 }
 0x768   :  { %v476_v10 = vmul.f32 %v1389_v35, %v470_v3 }
 0x769   :  { %v454_v62 = vsub.f32 1.5, %v453_v61 }
 0x76a   :  { %v1158_v0 = vpop.eup %1157 }
 0x76b   :  { %v455_v1 = vmul.f32 %v1156_v55, %v454_v62  ;;  %v461_v2 = vmul.f32 %v1158_v0, %v439_v56  ;;  %vm467_vm1 = vweird.f32 %v1158_v0  ;;  %583 = vmatpush.bf16.msrb.mxu1 %v1419_v21  ;;  %640 = vrot.lane.b32.xlu1 %v1132_v39, %s1252_s2  ;;  %v1110_v56 = vld [vmem:[#allocation2 + $0x44] sm:$0xf0] }
 0x76c   :  { %vm468_vm6 = vmor %vm466_vm5, %vm467_vm1  ;;  %vm799_vm1 = vcmask 1045504   ;;  %vm801_vm5 = vcmask 1046528  }
 0x76d   :  { %v462_v4 = vmul.f32 %v1158_v0, %v461_v2  ;;  %v459_v5 = vsel %vm458_vm0, %v1156_v55, %v455_v1  ;;  %v1076_v55 = vld [vmem:[#allocation2 + $0x34] sm:$0xf]  ;;  %vm795_vm0 = vcmask 1042432  }
 0x76e   :  { %v471_v6 = vmul.f32 %v459_v5, %v420_v24  ;;  %v1077_v58 = vor.u32 %v1110_v56, %v1076_v55  ;;  %v1108_v5 = vld [vmem:[#allocation2 + $0x30] sm:$0xf] }
 0x76f   :  { %v463_v7 = vmul.f32 0.5, %v462_v4  ;;  %v480_v8 = vpop.permute.xlu1 %479  ;;  %584 = vmatpush.bf16.msrb.mxu1 %v1425_v32 }
 0x770   :  { %v477_v9 = vmul.f32 %v1389_v35, %v471_v6  ;;  %v482_v12 = vadd.f32 %v480_v8, %v476_v10  ;;  %v1070_v6 = vld [vmem:[#allocation2 + $0x40] sm:$0xf0] }
 0x771   :  { %v464_v11 = vsub.f32 1.5, %v463_v7  ;;  %v1073_v7 = vor.u32 %v1108_v5, %v1070_v6 }
 0x772   :  { %v483_v29 = vadd.f32 %v480_v8, %v477_v9  ;;  %v504_v23 = vpop.permute.xlu0 %503  ;;  %v1058_v9 = vld [vmem:[#allocation2 + $0x18] sm:$0xf0] }
 0x773   :  { %v465_v13 = vmul.f32 %v1158_v0, %v464_v11  ;;  %645 = vrot.lane.b32.xlu1 %v1132_v39, %s1253_s22  ;;  %v1064_v11 = vld [vmem:[#allocation2 + $0xc] sm:$0xf] }
 0x774   :  { %v485_v14 = vpack.c.bf16 %v483_v29, %v482_v12  ;;  %v1107_v12 = vld [vmem:[#allocation2 + $0x1c] sm:$0xf0] }
 0x775   :  { %v469_v15 = vsel %vm468_vm6, %v1158_v0, %v465_v13 }
 0x776   :  { %1034 = vmatmul.msk.bf16.vlgmr.msra.gmra.mxu3 %vm156_vm4, %v485_v14  ;;  %v472_v16 = vmul.f32 %v469_v15, %v1384_v31 }
 0x778   :  { %v478_v17 = vmul.f32 %v1389_v35, %v472_v16 }
 0x77a   :  { %v484_v18 = vadd.f32 %v480_v8, %v478_v17  ;;  %v1105_v8 = vld [vmem:[#allocation2 + $0x8] sm:$0xf] }
 0x77b   :  { %692 = vrot.lane.b32.xlu1 %v1057_v54, %s1253_s22  ;;  %v1061_v10 = vor.u32 %v1105_v8, %v1058_v9 }
 0x77c   :  { %v486_v19 = vpack.c.bf16 %v484_v18, %v484_v18 }
 0x783   :  { %702 = vrot.lane.b32.xlu1 %v1077_v58, %s1253_s22  ;;  %v660_v58 = vld [vmem:[#allocation5 + $0x3] sm:$0x3] }
 0x786   :  { %1035 = vmatmul.msk.bf16.gmra.mxu3 %vm156_vm4, %v486_v19 }
 0x7d5   :  { %v699_v13 = vpop.permute.xlu1 %698 }
 0x7dd   :  { %v641_v14 = vpop.permute.xlu1 %640 }
 0x7e5   :  { %v646_v15 = vpop.permute.xlu1 %645 }
 0x7ed   :  { %v693_v16 = vpop.permute.xlu1 %692 }
 0x7f5   :  { %v703_v17 = vpop.permute.xlu1 %702 }
 0x7f6   :  { %826 = vmatpush.bf16.msra.mxu0 %v703_v17 }
 0x7f9   :  { %v521_v22 = vpop.f32.mrf.mxu3 }
 0x7fa   :  { %v522_v24 = vadd.f32 %v521_v22, %v504_v23 }
 0x7fc   :  { %v530_v27 = vmax.f32 %v522_v24, 0.0 }
 0x801   :  { %v523_v25 = vpop.f32.mrf.mxu3 }
 0x802   :  { %v524_v26 = vadd.f32 %v523_v25, %v504_v23 }
 0x804   :  { %v531_v28 = vmax.f32 %v524_v26, 0.0 }
 0x806   :  { %v533_v31 = vpack.c.bf16 %v531_v28, %v530_v27 }
 0x808   :  { %1052 = vmatmul.msk.bf16.vlgmr.msrb.gmra.mxu1 %vm104_vm2, %v533_v31 }
 0x809   :  { %v526_v33 = vpop.f32.mrf.mxu3 }
 0x80a   :  { %v527_v34 = vadd.f32 %v526_v33, %v504_v23 }
 0x80c   :  { %v532_v36 = vmax.f32 %v527_v34, 0.0 }
 0x80e   :  { %v534_v37 = vpack.c.bf16 %v532_v36, %v532_v36 }
 0x811   :  { %v528_v35 = vpop.f32.mrf.mxu3 }
 0x818   :  { %1053 = vmatmul.msk.bf16.gmra.mxu1 %vm104_vm2, %v534_v37 }
 0x885   :  { %v586_v38 = vpop.f32.mrf.mxu1 }
 0x88d   :  { %v587_v40 = vpop.f32.mrf.mxu1 }
 0x88e   :  { %v588_v41 = vadd.f32 %v1132_v39, %v587_v40 }
 0x890   :  { %v594_v42 = vadd.f32 %v588_v41, %v483_v29  ;;  %v1065_v29 = vor.u32 %v1107_v12, %v1064_v11 }
 0x892   :  { %v596_v43 = vsel %vm156_vm4, %v594_v42, 0.0 }
 0x893   :  { %597 = vadd.xlane.f32.xlu2 %v596_v43 }
 0x895   :  { %v590_v44 = vpop.f32.mrf.mxu1 }
 0x896   :  { %v591_v45 = vadd.f32 %v1132_v39, %v590_v44 }
 0x898   :  { %v595_v46 = vadd.f32 %v591_v45, %v484_v18 }
 0x89a   :  { %v599_v47 = vsel %vm405_vm9, %v595_v46, 0.0 }
 0x89b   :  { %600 = vadd.xlane.f32.xlu2 %v599_v47 }
 0x89d   :  { %v592_v48 = vpop.f32.mrf.mxu1 }
 0x906   :  { %v598_v57 = vpop.xlane.xlu2 %597 }
 0x907   :  { %v602_v59 = vmul.f32 %v598_v57, %v1377_v30 }
 0x909   :  { %v1437_v61 = vsub.f32 %v594_v42, %v602_v59  ;;  %v662_v59 = vperm.slane %v660_v58, 0 }
 0x90b   :  { %v606_v62 = vmul.f32 %v1437_v61, %v1437_v61 }
 0x90d   :  { %v608_v63 = vsel %vm156_vm4, %v606_v62, 0.0 }
 0x90e   :  { %609 = vadd.xlane.f32.xlu2 %v608_v63  ;;  %v601_v0 = vpop.xlane.xlu2 %600 }
 0x90f   :  { %v603_v1 = vmul.f32 %v601_v0, %v1377_v30 }
 0x911   :  { %v1444_v2 = vsub.f32 %v595_v46, %v603_v1 }
 0x913   :  { %v607_v3 = vmul.f32 %v1444_v2, %v1444_v2 }
 0x915   :  { %v611_v4 = vsel %vm405_vm9, %v607_v3, 0.0  ;;  %v663_v3 = vperm.slane %v660_v58, 1 }
 0x916   :  { %612 = vadd.xlane.f32.xlu0 %v611_v4 }
 0x926   :  { %700 = vrot.lane.b32.xlu2 %v1073_v7, %s1253_s22 }
 0x92e   :  { %694 = vrot.lane.b32.xlu2 %v1061_v10, %s1253_s22 }
 0x936   :  { %696 = vrot.lane.b32.xlu2 %v1065_v29, %s1253_s22  ;;  %v1483_v29 = vld [vmem:[#allocation5 + $0x5] ss:$0 sm:$0xff] }
 0x981   :  { %v610_v18 = vpop.xlane.xlu2 %609 }
 0x982   :  { %v614_v19 = vmul.f32 %v610_v18, %v1377_v30 }
 0x984   :  { %v616_v22 = vadd.f32 1e-05, %v614_v19 }
 0x986   :  { %1159 = vrsqrt.f32 %v616_v22  ;;  %vm624_vm10 = vweird.f32 %v616_v22 }
 0x989   :  { %v613_v23 = vpop.xlane.xlu0 %612  ;;  %v701_v24 = vpop.permute.xlu2 %700 }
 0x98a   :  { %v615_v25 = vmul.f32 %v613_v23, %v1377_v30  ;;  %v707_v26 = vsel %vm104_vm2, %v699_v13, %v701_v24  ;;  %v708_v36 = vsel %vm104_vm2, %v701_v24, %v703_v17 }
 0x98b   :  { %722 = vmatpush.bf16.msra.mxu2 %v707_v26 }
 0x98c   :  { %v1160_v27 = vpop.eup %1159  ;;  %v617_v28 = vadd.f32 1e-05, %v615_v25 }
 0x98d   :  { %v619_v31 = vmul.f32 %v1160_v27, %v616_v22  ;;  %vm625_vm9 = vweird.f32 %v1160_v27 }
 0x98e   :  { %1161 = vrsqrt.f32 %v617_v28  ;;  %vm626_vm11 = vmor %vm624_vm10, %vm625_vm9  ;;  %vm634_vm13 = vweird.f32 %v617_v28 }
 0x98f   :  { %v620_v33 = vmul.f32 %v1160_v27, %v619_v31 }
 0x991   :  { %v621_v34 = vmul.f32 0.5, %v620_v33  ;;  %v695_v35 = vpop.permute.xlu2 %694 }
 0x992   :  { %v705_v37 = vsel %vm104_vm2, %v693_v16, %v695_v35 }
 0x993   :  { %v622_v38 = vsub.f32 1.5, %v621_v34  ;;  %723 = vmatpush.bf16.msra.mxu2 %v705_v37 }
 0x994   :  { %v1162_v39 = vpop.eup %1161 }
 0x995   :  { %v629_v40 = vmul.f32 %v1162_v39, %v617_v28  ;;  %v623_v41 = vmul.f32 %v1160_v27, %v622_v38  ;;  %vm635_vm12 = vweird.f32 %v1162_v39 }
 0x996   :  { %vm636_vm14 = vmor %vm634_vm13, %vm635_vm12 }
 0x997   :  { %735 = vmatpush.bf16.msrb.mxu2 %v708_v36  ;;  %v630_v42 = vmul.f32 %v1162_v39, %v629_v40  ;;  %v627_v44 = vsel %vm626_vm11, %v1160_v27, %v623_v41 }
 0x998   :  { %v638_v48 = vmul.f32 %v627_v44, %v1437_v61 }
 0x999   :  { %v631_v43 = vmul.f32 0.5, %v630_v42  ;;  %v697_v45 = vpop.permute.xlu2 %696 }
 0x99a   :  { %v706_v46 = vsel %vm104_vm2, %v695_v35, %v697_v45  ;;  %827 = vmatpush.bf16.msra.mxu0 %v697_v45  ;;  %v643_v52 = vmul.f32 %v641_v14, %v638_v48 }
 0x99b   :  { %v632_v47 = vsub.f32 1.5, %v631_v43  ;;  %736 = vmatpush.bf16.msrb.mxu2 %v706_v46 }
 0x99c   :  { %v648_v54 = vadd.f32 %v646_v15, %v643_v52 }
 0x99d   :  { %v633_v49 = vmul.f32 %v1162_v39, %v632_v47 }
 0x99f   :  { %v637_v50 = vsel %vm636_vm14, %v1162_v39, %v633_v49 }
 0x9a0   :  { %v639_v51 = vmul.f32 %v637_v50, %v1444_v2 }
 0x9a2   :  { %v644_v53 = vmul.f32 %v641_v14, %v639_v51 }
 0x9a4   :  { %v649_v55 = vadd.f32 %v646_v15, %v644_v53 }
 0x9a6   :  { %v650_v56 = vsel %vm131_vm3, %v648_v54, %v649_v55 }
 0x9a7   :  { %v651_v57 = vpack.c.bf16 %v650_v56, %v650_v56 }
 0x9a9   :  { %1078 = vmatmul.msk.bf16.vlgmr.msra.gmra.mxu2 %vm156_vm4, %v651_v57 }
 0x9b9   :  { %1079 = vmatmul.msk.bf16.vlgmr.msrb.gmra.mxu2 %vm156_vm4, %v651_v57 }
 0xa2c   :  { %v725_v61 = vpop.f32.mrf.mxu2 }
 0xa2d   :  { %v726_v62 = vadd.f32 %v725_v61, %v662_v59 }
 0xa2f   :  { %772 = vrot.lane.b32.xlu1 %v726_v62, %s1252_s2  ;;  %v747_v63 = vrot.slane %v726_v62, 6  ;;  %v743_v0 = vrot.slane %v726_v62, 7  ;;  %v751_v2 = vrot.slane %v726_v62, 5  ;;  %v770_v17 = vrot.slane %v726_v62, 1 }
 0xa31   :  { %748 = vrot.lane.b32.xlu2 %v747_v63, %s1253_s22  ;;  %744 = vrot.lane.b32.xlu0 %v743_v0, %s1252_s2 }
 0xa34   :  { %v727_v1 = vpop.f32.mrf.mxu2 }
 0xa37   :  { %775 = vrot.lane.b32.xlu1 %v743_v0, %s1253_s22 }
 0xa39   :  { %752 = vrot.lane.b32.xlu2 %v751_v2, %s1250_s19 }
 0xa3c   :  { %v738_v4 = vpop.f32.mrf.mxu2 }
 0xa3d   :  { %v739_v5 = vadd.f32 %v738_v4, %v663_v3 }
 0xa3f   :  { %778 = vrot.lane.b32.xlu1 %v747_v63, %s1250_s19  ;;  %v758_v6 = vrot.slane %v739_v5, 3  ;;  %v756_v7 = vrot.slane %v739_v5, 4  ;;  %v762_v9 = vrot.slane %v739_v5, 2  ;;  %v766_v10 = vrot.slane %v739_v5, 1 }
 0xa40   :  { %v781_v25 = vrot.slane %v739_v5, 5 }
 0xa41   :  { %759 = vrot.lane.b32.xlu0 %v758_v6, %s1252_s2  ;;  %783 = vrot.lane.b32.xlu2 %v756_v7, %s1252_s2 }
 0xa44   :  { %v740_v8 = vpop.f32.mrf.mxu2 }
 0xa45   :  { %v1088_v8 = vld [vmem:[#allocation2 + $0x38] sm:$0xf] }
 0xa47   :  { %763 = vrot.lane.b32.xlu1 %v762_v9, %s1253_s22 }
 0xa49   :  { %786 = vrot.lane.b32.xlu0 %v758_v6, %s1253_s22  ;;  %767 = vrot.lane.b32.xlu2 %v766_v10, %s1250_s19  ;;  %v1134_v10 = vld [vmem:[#allocation5 + $0x6] ss:$0 sm:$0xff] }
 0xa4f   :  { %789 = vrot.lane.b32.xlu1 %v762_v9, %s1250_s19  ;;  %v1112_v9 = vld [vmem:[#allocation2 + $0x48] sm:$0xf0] }
 0xa51   :  { %843 = vrot.lane.b32.xlu0 %v1401_v60, %s1252_s2  ;;  %841 = vrot.lane.b32.xlu2 %v1413_v20, %s1252_s2 }
 0xa57   :  { %839 = vrot.lane.b32.xlu1 %v1419_v21, %s1252_s2 }
 0xa59   :  { %837 = vrot.lane.b32.xlu0 %v1425_v32, %s1252_s2  ;;  %849 = vrot.lane.b32.xlu2 %v1483_v29, %s1253_s22 }
 0xa8b   :  { %v749_v12 = vpop.permute.xlu2 %748 }
 0xa93   :  { %v753_v15 = vpop.permute.xlu2 %752 }
 0xa9b   :  { %v784_v21 = vpop.permute.xlu2 %783 }
 0xaa1   :  { %v773_v11 = vpop.permute.xlu1 %772 }
 0xaa2   :  { %v803_v32 = vsel %vm131_vm3, %v770_v17, %v773_v11  ;;  %v1089_v11 = vor.u32 %v1112_v9, %v1088_v8 }
 0xaa3   :  { %v745_v14 = vpop.permute.xlu0 %744  ;;  %v768_v35 = vpop.permute.xlu2 %767 }
 0xaa4   :  { %v792_v20 = vsel %vm131_vm3, %v726_v62, %v745_v14  ;;  %955 = vmatpush.bf16.msra.mxu1 %v1089_v11  ;;  %v1084_v14 = vld [vmem:[#allocation2 + $0x10] sm:$0xf] }
 0xaa5   :  { %v794_v18 = vsel %vm793_vm15, %v792_v20, %v749_v12 }
 0xaa6   :  { %v796_v24 = vsel %vm795_vm0, %v794_v18, %v753_v15  ;;  %v1111_v15 = vld [vmem:[#allocation2 + $0x20] sm:$0xf0] }
 0xaa7   :  { %v797_v28 = vsel %vm237_vm7, %v796_v24, %v756_v7 }
 0xaa9   :  { %v776_v13 = vpop.permute.xlu1 %775 }
 0xaaa   :  { %v804_v19 = vsel %vm793_vm15, %v803_v32, %v776_v13 }
 0xaab   :  { %v842_v42 = vpop.permute.xlu2 %841 }
 0xab1   :  { %v779_v60 = vpop.permute.xlu1 %778 }
 0xab2   :  { %v805_v23 = vsel %vm795_vm0, %v804_v19, %v779_v60 }
 0xab3   :  { %v760_v16 = vpop.permute.xlu0 %759  ;;  %v806_v27 = vsel %vm237_vm7, %v805_v23, %v781_v25  ;;  %v850_v52 = vpop.permute.xlu2 %849 }
 0xab4   :  { %v798_v31 = vsel %vm238_vm8, %v797_v28, %v760_v16  ;;  %v807_v34 = vsel %vm238_vm8, %v806_v27, %v784_v21  ;;  %v1085_v16 = vor.u32 %v1111_v15, %v1084_v14 }
 0xab6   :  { %956 = vmatpush.bf16.msra.mxu1 %v1085_v16 }
 0xab9   :  { %v764_v22 = vpop.permute.xlu1 %763 }
 0xaba   :  { %v800_v33 = vsel %vm799_vm1, %v798_v31, %v764_v22 }
 0xabb   :  { %v787_v26 = vpop.permute.xlu0 %786  ;;  %v802_v38 = vsel %vm801_vm5, %v800_v33, %v768_v35 }
 0xabc   :  { %v808_v36 = vsel %vm799_vm1, %v807_v34, %v787_v26 }
 0xac1   :  { %v790_v37 = vpop.permute.xlu1 %789 }
 0xac2   :  { %v809_v39 = vsel %vm801_vm5, %v808_v36, %v790_v37 }
 0xac3   :  { %v810_v40 = vpack.c.bf16 %v809_v39, %v802_v38  ;;  %v844_v41 = vpop.permute.xlu0 %843 }
 0xac4   :  { %859 = vmatpush.bf16.msrb.mxu3 %v844_v41 }
 0xac5   :  { %1080 = vmatmul.msk.bf16.vlgmr.msra.gmra.mxu0 %vm156_vm4, %v810_v40 }
 0xac8   :  { %860 = vmatpush.bf16.msrb.mxu3 %v842_v42 }
 0xac9   :  { %v840_v43 = vpop.permute.xlu1 %839 }
 0xacb   :  { %v838_v44 = vpop.permute.xlu0 %837 }
 0xacc   :  { %861 = vmatpush.bf16.msrb.mxu3 %v840_v43 }
 0xad0   :  { %862 = vmatpush.bf16.msrb.mxu3 %v838_v44 }
 0xb42   :  { %v829_v45 = vpop.f32.mrf.mxu0 }
 0xb43   :  { %v830_v46 = vadd.f32 %v1483_v29, %v829_v45 }
 0xb45   :  { %v834_v49 = vmax.f32 %v830_v46, 0.0 }
 0xb4a   :  { %v831_v47 = vpop.f32.mrf.mxu0 }
 0xb4b   :  { %v832_v48 = vadd.f32 %v1483_v29, %v831_v47 }
 0xb4d   :  { %v835_v50 = vmax.f32 %v832_v48, 0.0 }
 0xb4f   :  { %v836_v51 = vpack.c.bf16 %v835_v50, %v834_v49 }
 0xb51   :  { %1081 = vmatmul.msk.bf16.vlgmr.msrb.gmra.mxu3 %vm104_vm2, %v836_v51 }
 0xbd4   :  { %v864_v53 = vpop.f32.mrf.mxu3 }
 0xbd5   :  { %v865_v54 = vadd.f32 %v864_v53, %v850_v52 }
 0xbd7   :  { %v869_v55 = vadd.f32 %v865_v54, %v802_v38 }
 0xbd9   :  { %v872_v56 = vsel %vm156_vm4, %v869_v55, 0.0 }
 0xbda   :  { %873 = vadd.xlane.f32.xlu1 %v872_v56 }
 0xbdc   :  { %v866_v57 = vpop.f32.mrf.mxu3 }
 0xbdd   :  { %v867_v58 = vadd.f32 %v866_v57, %v850_v52 }
 0xbdf   :  { %v870_v59 = vadd.f32 %v867_v58, %v809_v39 }
 0xbe1   :  { %v875_v61 = vsel %vm156_vm4, %v870_v59, 0.0 }
 0xbe2   :  { %876 = vadd.xlane.f32.xlu0 %v875_v61 }
 0xbf6   :  { %943 = vrot.lane.b32.xlu0 %v1134_v10, %s1252_s2 }
 0xc4d   :  { %v874_v62 = vpop.xlane.xlu1 %873 }
 0xc4e   :  { %v878_v63 = vmul.f32 %v874_v62, %v1377_v30 }
 0xc50   :  { %v880_v0 = vsub.f32 %v869_v55, %v878_v63 }
 0xc52   :  { %v882_v1 = vmul.f32 %v880_v0, %v880_v0 }
 0xc54   :  { %v884_v2 = vsel %vm156_vm4, %v882_v1, 0.0 }
 0xc55   :  { %v877_v3 = vpop.xlane.xlu0 %876  ;;  %885 = vadd.xlane.f32.xlu2 %v884_v2 }
 0xc56   :  { %v879_v4 = vmul.f32 %v877_v3, %v1377_v30 }
 0xc58   :  { %v881_v5 = vsub.f32 %v870_v59, %v879_v4 }
 0xc5a   :  { %v883_v6 = vmul.f32 %v881_v5, %v881_v5 }
 0xc5c   :  { %v887_v7 = vsel %vm156_vm4, %v883_v6, 0.0 }
 0xc5d   :  { %888 = vadd.xlane.f32.xlu1 %v887_v7 }
 0xc68   :  { %v944_v42 = vpop.permute.xlu0 %943 }
 0xc6d   :  { %916 = vrot.lane.b32.xlu2 %v1483_v29, %s1250_s19 }
 0xcc8   :  { %v886_v12 = vpop.xlane.xlu2 %885 }
 0xcc9   :  { %v890_v13 = vmul.f32 %v886_v12, %v1377_v30 }
 0xccb   :  { %v892_v60 = vadd.f32 1e-05, %v890_v13 }
 0xccd   :  { %1163 = vrsqrt.f32 %v892_v60  ;;  %vm900_vm7 = vweird.f32 %v892_v60 }
 0xcd0   :  { %v889_v20 = vpop.xlane.xlu1 %888 }
 0xcd1   :  { %v891_v17 = vmul.f32 %v889_v20, %v1377_v30  ;;  %v917_v30 = vpop.permute.xlu2 %916 }
 0xcd3   :  { %v1164_v29 = vpop.eup %1163  ;;  %v893_v21 = vadd.f32 1e-05, %v891_v17 }
 0xcd4   :  { %v895_v18 = vmul.f32 %v1164_v29, %v892_v60  ;;  %vm901_vm3 = vweird.f32 %v1164_v29 }
 0xcd5   :  { %1165 = vrsqrt.f32 %v893_v21  ;;  %vm902_vm8 = vmor %vm900_vm7, %vm901_vm3  ;;  %vm910_vm9 = vweird.f32 %v893_v21 }
 0xcd6   :  { %v896_v32 = vmul.f32 %v1164_v29, %v895_v18 }
 0xcd8   :  { %v897_v19 = vmul.f32 0.5, %v896_v32 }
 0xcda   :  { %v898_v22 = vsub.f32 1.5, %v897_v19 }
 0xcdb   :  { %v1166_v23 = vpop.eup %1165 }
 0xcdc   :  { %v905_v24 = vmul.f32 %v1166_v23, %v893_v21  ;;  %v899_v25 = vmul.f32 %v1164_v29, %v898_v22  ;;  %vm911_vm6 = vweird.f32 %v1166_v23 }
 0xcdd   :  { %vm912_vm10 = vmor %vm910_vm9, %vm911_vm6 }
 0xcde   :  { %v906_v26 = vmul.f32 %v1166_v23, %v905_v24  ;;  %v903_v28 = vsel %vm902_vm8, %v1164_v29, %v899_v25 }
 0xcdf   :  { %v914_v33 = vmul.f32 %v903_v28, %v880_v0 }
 0xce0   :  { %v907_v27 = vmul.f32 0.5, %v906_v26 }
 0xce1   :  { %v919_v37 = vmul.f32 %v917_v30, %v914_v33 }
 0xce2   :  { %v908_v31 = vsub.f32 1.5, %v907_v27 }
 0xce3   :  { %v924_v39 = vadd.f32 %v1134_v10, %v919_v37 }
 0xce4   :  { %v909_v34 = vmul.f32 %v1166_v23, %v908_v31 }
 0xce6   :  { %v913_v35 = vsel %vm912_vm10, %v1166_v23, %v909_v34 }
 0xce7   :  { %v915_v36 = vmul.f32 %v913_v35, %v881_v5 }
 0xce9   :  { %v920_v38 = vmul.f32 %v917_v30, %v915_v36 }
 0xceb   :  { %v925_v40 = vadd.f32 %v1134_v10, %v920_v38 }
 0xced   :  { %v926_v41 = vpack.c.bf16 %v925_v40, %v924_v39 }
 0xcef   :  { %1090 = vmatmul.msk.bf16.vlgmr.msra.gmra.mxu1 %vm156_vm4, %v926_v41 }
 0xd6c   :  { %v958_v43 = vpop.f32.mrf.mxu1 }
 0xd6d   :  { %v959_v44 = vadd.f32 %v958_v43, %v944_v42 }
 0xd6f   :  { %963 = vst.msk [vmem:[#allocation7] sm:$0xff] %vm104_vm2, %v959_v44 }
 0xd74   :  { %v960_v45 = vpop.f32.mrf.mxu1 }
 0xd75   :  { %v961_v46 = vadd.f32 %v960_v45, %v944_v42 }
 0xd77   :  { %964 = vst.msk [vmem:[#allocation7 + $0x8] sm:$0xff] %vm104_vm2, %v961_v46 }
 0xd78   :  { %977 = dma.vmem_to_hbm [thread:$0]  %s970_s7, 256, %s972_s9, [#allocation4], %s1257_s10, %s1257_s10, %s1258_s5  }
 0xd79   :  { %1243 = dma.done.wait [#allocation4], 256  }
 0xd7a   :  { %1244 = vsyncadd [#allocation4], 4294967040 }
 0xd7b   :  { %982 = vsyncpa [#allocation3], 1 }
 0xd7c   :  { %983 = vsyncpa [#allocation6], 1 }
 0xd7d   :  { %984 = vsyncpa [#allocation4], 1 }

</bundles_post_ra>
